<compile_context>
chip_gen: v7x
topology: tpu7x:2x2x1
jax: 0.10.0
libtpu: 0.0.40
codegen_flags: <defaults>
</compile_context>

<pallas_src>
import functools

import jax
import jax.numpy as jnp
from jax.experimental import pallas as pl
from jax.experimental.pallas import tpu as pltpu


N_PAD = 128  # lane-dense padded width of the 10-class output


def mlp_kernel(x_ref, w1_ref, b1_ref, w2_ref, b2_ref, w3_ref, b3_ref, out_ref):
    # Cast x f32 -> bf16 in VMEM (VPU work, hidden under MXU/DMA) instead of a separate
    # XLA pass over x in the wrapper.
    x = x_ref[...].astype(jnp.bfloat16)
    # fc1: (TM, 3072) @ (3072, 256), f32 accumulate; bias + ReLU in f32.
    h1 = jnp.dot(x, w1_ref[...], preferred_element_type=jnp.float32)
    h1 = jnp.maximum(h1 + b1_ref[...], 0.0).astype(jnp.bfloat16)
    # fc2: (TM, 256) @ (256, 256)
    h2 = jnp.dot(h1, w2_ref[...], preferred_element_type=jnp.float32)
    h2 = jnp.maximum(h2 + b2_ref[...], 0.0).astype(jnp.bfloat16)
    # fc3: (TM, 256) @ (256, 128)  (output zero-padded to 128 lanes -> unmasked dense vst)
    out = jnp.dot(h2, w3_ref[...], preferred_element_type=jnp.float32)
    out_ref[...] = (out + b3_ref[...]).astype(out_ref.dtype)


def _round_up(n, m):
    return ((n + m - 1) // m) * m


def _choose_tm(batch, tm_max):
    """Adaptive row tile: large enough to amortize per-grid-step overhead, small enough
    not to waste work on tiny batches, and split into >=2 tiles when possible so both
    v7x TensorCores get work on the 'parallel' batch axis."""
    m8 = max(8, _round_up(batch, 8))
    if m8 <= tm_max:
        if m8 >= 512:                       # ensure grid has >= 2 steps (megacore)
            return _round_up(pl.cdiv(m8, 2), 8)
        return m8
    return tm_max


@functools.partial(jax.jit, static_argnames=("tm",))
def _mlp_pallas(x, w1, b1, w2, b2, w3, b3, *, tm):
    batch, d_in = x.shape
    n_pad = w3.shape[1]
    grid = (pl.cdiv(batch, tm),)            # ragged tail handled by Pallas edge masking
    resident = lambda i: (0, 0)

    def res_spec(a):
        # Weights/biases: same block every grid step -> resident in VMEM; single-buffered
        # (they are DMA'd once), freeing VMEM headroom for larger x tiles.
        return pl.BlockSpec(a.shape, resident, pipeline_mode=pl.Buffered(1))

    # VMEM budget: double-buffered f32 x tiles + double-buffered bf16 out tiles +
    # resident weights / f32 temporaries headroom.  Default tm=1024 -> ~37 MiB,
    # which fits v7x's 64 MiB per-TC VMEM; raise tm (and this limit) on v5e/v6e.
    vmem_limit = min(100 << 20,
                     2 * tm * d_in * 4 + 2 * tm * n_pad * 2 + (12 << 20))

    return pl.pallas_call(
        mlp_kernel,
        out_shape=jax.ShapeDtypeStruct((batch, n_pad), jnp.bfloat16),
        grid=grid,
        in_specs=[
            pl.BlockSpec((tm, d_in), lambda i: (i, 0)),   # streamed f32 x tile
            res_spec(w1), res_spec(b1),
            res_spec(w2), res_spec(b2),
            res_spec(w3), res_spec(b3),
        ],
        out_specs=pl.BlockSpec((tm, n_pad), lambda i: (i, 0)),
        compiler_params=pltpu.CompilerParams(
            dimension_semantics=("parallel",),   # batch tiles -> both TCs on v7x
            vmem_limit_bytes=vmem_limit,
        ),
    )(x, w1, b1, w2, b2, w3, b3)


def prepare_params(params):
    """One-time prep (outside the jitted per-call path): bf16 matmul operands,
    f32 biases, final layer zero-padded to 128 output lanes."""
    w1, b1, w2, b2, w3, b3 = params
    n_out = w3.shape[1]
    w3p = jnp.zeros((w3.shape[0], N_PAD), w3.dtype).at[:, :n_out].set(w3)
    b3p = jnp.zeros((1, N_PAD), jnp.float32).at[:, :n_out].set(
        b3.reshape(1, -1).astype(jnp.float32))
    return (
        w1.astype(jnp.bfloat16), b1.reshape(1, -1).astype(jnp.float32),
        w2.astype(jnp.bfloat16), b2.reshape(1, -1).astype(jnp.float32),
        w3p.astype(jnp.bfloat16), b3p,
    )


def mlp_forward(x, prepared_params, *, n_out=10, tm=1024):
    """x: (batch, 3072) f32.  prepared_params: output of prepare_params().  -> (batch, 10) f32."""
    tm_eff = _choose_tm(x.shape[0], tm)
    out = _mlp_pallas(x, *prepared_params, tm=tm_eff)
    return out[:, :n_out].astype(jnp.float32)


def init_params(key):
    """Deterministic init mimicking nn.Linear's uniform(-1/sqrt(fan_in), 1/sqrt(fan_in))."""
    def linear(k, fan_in, fan_out):
        kw, kb = jax.random.split(k)
        bound = 1.0 / jnp.sqrt(fan_in)
        w = jax.random.uniform(kw, (fan_in, fan_out), jnp.float32, -bound, bound)
        b = jax.random.uniform(kb, (1, fan_out), jnp.float32, -bound, bound)
        return w, b

    k1, k2, k3 = jax.random.split(key, 3)
    w1, b1 = linear(k1, 3072, 256)
    w2, b2 = linear(k2, 256, 256)
    w3, b3 = linear(k3, 256, 10)
    return (w1, b1, w2, b2, w3, b3)


if __name__ == "__main__":
    key = jax.random.PRNGKey(0)
    k_params, k_x = jax.random.split(key)
    params = init_params(k_params)
    prepared = prepare_params(params)      # one-time cast/pad, outside the hot path

    batch = 2
    x = jax.random.normal(k_x, (batch, 3072), jnp.float32)  # flattened CIFAR 3*32*32

    out = mlp_forward(x, prepared)
    out = jax.block_until_ready(out)
    assert out.shape == (batch, 10)

    # Reference at matching precision (bf16 matmuls, f32 accumulate).
    w1, b1, w2, b2, w3, b3 = params
    xb = x.astype(jnp.bfloat16)
    h = jnp.maximum(
        jnp.dot(xb, w1.astype(jnp.bfloat16), preferred_element_type=jnp.float32) + b1, 0.0
    ).astype(jnp.bfloat16)
    h = jnp.maximum(
        jnp.dot(h, w2.astype(jnp.bfloat16), preferred_element_type=jnp.float32) + b2, 0.0
    ).astype(jnp.bfloat16)
    ref_bf16 = jnp.dot(h, w3.astype(jnp.bfloat16), preferred_element_type=jnp.float32) + b3
    assert jnp.allclose(out, ref_bf16, atol=2e-2, rtol=2e-2), "mismatch vs bf16 reference"

    # Sanity check against full-f32 reference with bf16-appropriate tolerance.
    hf = jnp.maximum(x @ w1 + b1, 0.0)
    hf = jnp.maximum(hf @ w2 + b2, 0.0)
    ref_f32 = hf @ w3 + b3
    assert jnp.allclose(out, ref_f32, atol=6e-2, rtol=6e-2), "mismatch vs f32 reference"

    print("KERNEL_OK")
</pallas_src>

<mosaic_0001>
module attributes {stable_mosaic.version = 11 : i64} {
  func.func @mlp_kernel(%arg0: i32, %arg1: memref<8x3072xf32, #tpu.memory_space<vmem>>, %arg2: memref<3072x256xbf16, #tpu.memory_space<vmem>>, %arg3: memref<1x256xf32, #tpu.memory_space<vmem>>, %arg4: memref<256x256xbf16, #tpu.memory_space<vmem>>, %arg5: memref<1x256xf32, #tpu.memory_space<vmem>>, %arg6: memref<256x128xbf16, #tpu.memory_space<vmem>>, %arg7: memref<1x128xf32, #tpu.memory_space<vmem>>, %arg8: memref<8x128xbf16, #tpu.memory_space<vmem>>) attributes {dimension_semantics = [#tpu.dimension_semantics<parallel>], iteration_bounds = array<i64: 1>, scalar_prefetch = 0 : i64, scratch_operands = 0 : i64, tpu.core_type = #tpu.core_type<tc>, window_params = [{transform_indices = @transform_0, window_bounds = array<i64: 8, 3072>}, {pipeline_mode = #tpu.pipeline_mode<synchronous>, transform_indices = @transform_1, window_bounds = array<i64: 3072, 256>}, {pipeline_mode = #tpu.pipeline_mode<synchronous>, transform_indices = @transform_2, window_bounds = array<i64: 1, 256>}, {pipeline_mode = #tpu.pipeline_mode<synchronous>, transform_indices = @transform_3, window_bounds = array<i64: 256, 256>}, {pipeline_mode = #tpu.pipeline_mode<synchronous>, transform_indices = @transform_4, window_bounds = array<i64: 1, 256>}, {pipeline_mode = #tpu.pipeline_mode<synchronous>, transform_indices = @transform_5, window_bounds = array<i64: 256, 128>}, {pipeline_mode = #tpu.pipeline_mode<synchronous>, transform_indices = @transform_6, window_bounds = array<i64: 1, 128>}, {transform_indices = @transform_7, window_bounds = array<i64: 8, 128>}]} {
    %c0 = arith.constant 0 : index
    %c0_0 = arith.constant 0 : index
    %0 = vector.load %arg1[%c0, %c0_0] : memref<8x3072xf32, #tpu.memory_space<vmem>>, vector<8x3072xf32>
    %1 = arith.truncf %0 : vector<8x3072xf32> to vector<8x3072xbf16>
    %c0_1 = arith.constant 0 : index
    %c0_2 = arith.constant 0 : index
    %2 = vector.load %arg2[%c0_1, %c0_2] : memref<3072x256xbf16, #tpu.memory_space<vmem>>, vector<3072x256xbf16>
    %cst = arith.constant dense<0.000000e+00> : vector<8x256xf32>
    %3 = tpu.matmul %1, %2, %cst {dimension_numbers = #tpu.dot_dimension_numbers<[1], [0], [0], [1], [0, 0, 1, 1], [], []>} : vector<8x3072xbf16>, vector<3072x256xbf16>, vector<8x256xf32> -> vector<8x256xf32>
    %c0_3 = arith.constant 0 : index
    %c0_4 = arith.constant 0 : index
    %4 = vector.load %arg3[%c0_3, %c0_4] : memref<1x256xf32, #tpu.memory_space<vmem>>, vector<1x256xf32>
    %5 = vector.broadcast %4 : vector<1x256xf32> to vector<8x256xf32>
    %6 = arith.addf %3, %5 : vector<8x256xf32>
    %cst_5 = arith.constant 0.000000e+00 : f32
    %7 = vector.broadcast %cst_5 : f32 to vector<8x256xf32>
    %8 = arith.maximumf %6, %7 : vector<8x256xf32>
    %9 = arith.truncf %8 : vector<8x256xf32> to vector<8x256xbf16>
    %c0_6 = arith.constant 0 : index
    %c0_7 = arith.constant 0 : index
    %10 = vector.load %arg4[%c0_6, %c0_7] : memref<256x256xbf16, #tpu.memory_space<vmem>>, vector<256x256xbf16>
    %cst_8 = arith.constant dense<0.000000e+00> : vector<8x256xf32>
    %11 = tpu.matmul %9, %10, %cst_8 {dimension_numbers = #tpu.dot_dimension_numbers<[1], [0], [0], [1], [0, 0, 1, 1], [], []>} : vector<8x256xbf16>, vector<256x256xbf16>, vector<8x256xf32> -> vector<8x256xf32>
    %c0_9 = arith.constant 0 : index
    %c0_10 = arith.constant 0 : index
    %12 = vector.load %arg5[%c0_9, %c0_10] : memref<1x256xf32, #tpu.memory_space<vmem>>, vector<1x256xf32>
    %13 = vector.broadcast %12 : vector<1x256xf32> to vector<8x256xf32>
    %14 = arith.addf %11, %13 : vector<8x256xf32>
    %cst_11 = arith.constant 0.000000e+00 : f32
    %15 = vector.broadcast %cst_11 : f32 to vector<8x256xf32>
    %16 = arith.maximumf %14, %15 : vector<8x256xf32>
    %17 = arith.truncf %16 : vector<8x256xf32> to vector<8x256xbf16>
    %c0_12 = arith.constant 0 : index
    %c0_13 = arith.constant 0 : index
    %18 = vector.load %arg6[%c0_12, %c0_13] : memref<256x128xbf16, #tpu.memory_space<vmem>>, vector<256x128xbf16>
    %cst_14 = arith.constant dense<0.000000e+00> : vector<8x128xf32>
    %19 = tpu.matmul %17, %18, %cst_14 {dimension_numbers = #tpu.dot_dimension_numbers<[1], [0], [0], [1], [0, 0, 1, 1], [], []>} : vector<8x256xbf16>, vector<256x128xbf16>, vector<8x128xf32> -> vector<8x128xf32>
    %c0_15 = arith.constant 0 : index
    %c0_16 = arith.constant 0 : index
    %20 = vector.load %arg7[%c0_15, %c0_16] : memref<1x128xf32, #tpu.memory_space<vmem>>, vector<1x128xf32>
    %21 = vector.broadcast %20 : vector<1x128xf32> to vector<8x128xf32>
    %22 = arith.addf %19, %21 : vector<8x128xf32>
    %23 = arith.truncf %22 : vector<8x128xf32> to vector<8x128xbf16>
    %c0_17 = arith.constant 0 : index
    %c0_18 = arith.constant 0 : index
    %24 = vector.load %arg8[%c0_17, %c0_18] : memref<8x128xbf16, #tpu.memory_space<vmem>>, vector<8x128xbf16>
    tpu.vector_store %arg8[%c0_17, %c0_18], %23 {strides = array<i32>} : memref<8x128xbf16, #tpu.memory_space<vmem>>, vector<8x128xbf16>,
    return
  }
  func.func @transform_0(%arg0: i32) -> (i32, i32) {
    %c0_i32 = arith.constant 0 : i32
    %c0_i32_0 = arith.constant 0 : i32
    return %arg0, %c0_i32 : i32, i32
  }
  func.func @transform_1(%arg0: i32) -> (i32, i32) {
    %c0_i32 = arith.constant 0 : i32
    %c0_i32_0 = arith.constant 0 : i32
    %c0_i32_1 = arith.constant 0 : i32
    return %c0_i32, %c0_i32_0 : i32, i32
  }
  func.func @transform_2(%arg0: i32) -> (i32, i32) {
    %c0_i32 = arith.constant 0 : i32
    %c0_i32_0 = arith.constant 0 : i32
    %c0_i32_1 = arith.constant 0 : i32
    return %c0_i32, %c0_i32_0 : i32, i32
  }
  func.func @transform_3(%arg0: i32) -> (i32, i32) {
    %c0_i32 = arith.constant 0 : i32
    %c0_i32_0 = arith.constant 0 : i32
    %c0_i32_1 = arith.constant 0 : i32
    return %c0_i32, %c0_i32_0 : i32, i32
  }
  func.func @transform_4(%arg0: i32) -> (i32, i32) {
    %c0_i32 = arith.constant 0 : i32
    %c0_i32_0 = arith.constant 0 : i32
    %c0_i32_1 = arith.constant 0 : i32
    return %c0_i32, %c0_i32_0 : i32, i32
  }
  func.func @transform_5(%arg0: i32) -> (i32, i32) {
    %c0_i32 = arith.constant 0 : i32
    %c0_i32_0 = arith.constant 0 : i32
    %c0_i32_1 = arith.constant 0 : i32
    return %c0_i32, %c0_i32_0 : i32, i32
  }
  func.func @transform_6(%arg0: i32) -> (i32, i32) {
    %c0_i32 = arith.constant 0 : i32
    %c0_i32_0 = arith.constant 0 : i32
    %c0_i32_1 = arith.constant 0 : i32
    return %c0_i32, %c0_i32_0 : i32, i32
  }
  func.func @transform_7(%arg0: i32) -> (i32, i32) {
    %c0_i32 = arith.constant 0 : i32
    %c0_i32_0 = arith.constant 0 : i32
    return %arg0, %c0_i32 : i32, i32
  }
}

</mosaic_0001>

<bundles_post_ra>
// kernel: _mlp_pallas.1
= control target key start
LH: loop header
LB: loop body
LE: loop exit
PB: predicated region body
PF: predicated region fallthrough
CT: control target
= control target key end

     0   :  { %12 = vsyncpa [#allocation3], 0  ;;  %s5366_s0 = inlined_call_operand.hbm [shape: f32[2,3072], index: 0, kind: input, shape index: {}]   ;;  %s5367_s1 = inlined_call_operand.hbm [shape: bf16[3072,256], index: 1, kind: input, shape index: {}]   ;;  %s5368_s2 = inlined_call_operand.hbm [shape: f32[1,256], index: 2, kind: input, shape index: {}]   ;;  %s5369_s3 = inlined_call_operand.hbm [shape: bf16[256,256], index: 3, kind: input, shape index: {}]   ;;  %s5370_s4 = inlined_call_operand.hbm [shape: f32[1,256], index: 4, kind: input, shape index: {}]   ;;  %s5371_s5 = inlined_call_operand.hbm [shape: bf16[256,128], index: 5, kind: input, shape index: {}]   ;;  %s5372_s6 = inlined_call_operand.hbm [shape: f32[1,128], index: 6, kind: input, shape index: {}]   ;;  %s5373_s7 = inlined_call_operand.hbm [shape: bf16[2,128], index: 7, kind: output, shape index: {}]  }
   0x1   :  { %13 = vsyncpa [#allocation6], 0 }
   0x2   :  { %14 = vsyncpa [#allocation9], 0 }
   0x3   :  { %15 = vsyncpa [#allocation12], 0 }
   0x4   :  { %16 = vsyncpa [#allocation4], 0 }
   0x5   :  { %21 = vsyncadd [#allocation3], 2304  ;;  %s5100_s24 = smov [#allocation5]   ;;  %s4914_s28 = scalar_lea.hbm %s5367_s1, 49152 }
   0x6   :  { %s34_s25 = sshll.u32 %s5100_s24, 4  ;;  %p4915_p0 = scmp.ne.s32.totalorder %s5367_s1, %s4914_s28  ;;  %s35_s25 = int_to_ptr.vmem [resolvable:$true] %s34_s25 }
   0x7   :  { %p4918_p1 = scmp.lt.u32.totalorder %s4914_s28, %s5367_s1 }
   0x9   :  { %p4920_p2 = pnand %p4918_p1, %p4915_p0 }
   0xb   :  { %4923 = shalt.err (!%p4920_p2)
}
   0xc   :  { %s4924_s10 = scalar_lea.vmem %s35_s25, 49152  ;;  %p4929_p4 = scmp.lt.s32.totalorder %s35_s25, %s35_s25 }
   0xd   :  { %p4925_p3 = scmp.ne.s32.totalorder %s35_s25, %s4924_s10  ;;  %p4930_p5 = scmp.lt.s32.totalorder %s4924_s10, %s4924_s10 }
   0xf   :  { %p4931_p6 = por %p4930_p5, %p4929_p4 }
  0x11   :  { %p4932_p7 = pnand %p4931_p6, %p4925_p3 }
  0x13   :  { %4935 = shalt.err (!%p4932_p7)
}
  0x14   :  { %s5101_s11 = smov 128   ;;  %s5102_s12 = smov 8  }
  0x15   :  { %40 = dma.hbm_to_vmem [thread:$0]  %s5367_s1, 49152, %s35_s25, [#allocation6], %s5101_s11, %s5101_s11, %s5102_s12  }
  0x16   :  { %s5103_s15 = smov [#allocation8]   ;;  %s5104_s17 = smov [#allocation11]  }
  0x17   :  { %s56_s16 = sshll.u32 %s5103_s15, 4  ;;  %s78_s18 = sshll.u32 %s5104_s17, 4  ;;  %s57_s16 = int_to_ptr.vmem [resolvable:$true] %s56_s16  ;;  %s79_s18 = int_to_ptr.vmem [resolvable:$true] %s78_s18 }
  0x18   :  { %s4936_s21 = scalar_lea.hbm %s5369_s3, 4096 }
  0x19   :  { %p4937_p8 = scmp.ne.s32.totalorder %s5369_s3, %s4936_s21  ;;  %p4940_p9 = scmp.lt.u32.totalorder %s4936_s21, %s5369_s3 }
  0x1b   :  { %p4942_p10 = pnand %p4940_p9, %p4937_p8 }
  0x1d   :  { %4945 = shalt.err (!%p4942_p10)
}
  0x1e   :  { %s4946_s1 = scalar_lea.vmem %s57_s16, 4096  ;;  %p4951_p12 = scmp.lt.s32.totalorder %s57_s16, %s57_s16 }
  0x1f   :  { %p4947_p11 = scmp.ne.s32.totalorder %s57_s16, %s4946_s1  ;;  %p4952_p13 = scmp.lt.s32.totalorder %s4946_s1, %s4946_s1 }
  0x21   :  { %p4953_p0 = por %p4952_p13, %p4951_p12 }
  0x23   :  { %p4954_p1 = pnand %p4953_p0, %p4947_p11 }
  0x25   :  { %4957 = shalt.err (!%p4954_p1)
}
  0x26   :  { %62 = dma.hbm_to_vmem [thread:$0]  %s5369_s3, 4096, %s57_s16, [#allocation9], %s5101_s11, %s5101_s11, %s5102_s12  }
  0x27   :  { %s4958_s30 = scalar_lea.hbm %s5371_s5, 2048 }
  0x28   :  { %p4959_p2 = scmp.ne.s32.totalorder %s5371_s5, %s4958_s30  ;;  %p4962_p3 = scmp.lt.u32.totalorder %s4958_s30, %s5371_s5 }
  0x2a   :  { %p4964_p4 = pnand %p4962_p3, %p4959_p2 }
  0x2c   :  { %4967 = shalt.err (!%p4964_p4)
}
  0x2d   :  { %s4968_s14 = scalar_lea.vmem %s79_s18, 2048  ;;  %p4973_p6 = scmp.lt.s32.totalorder %s79_s18, %s79_s18 }
  0x2e   :  { %p4969_p5 = scmp.ne.s32.totalorder %s79_s18, %s4968_s14  ;;  %p4974_p7 = scmp.lt.s32.totalorder %s4968_s14, %s4968_s14 }
  0x30   :  { %p4975_p8 = por %p4974_p7, %p4973_p6 }
  0x32   :  { %p4976_p9 = pnand %p4975_p8, %p4969_p5 }
  0x34   :  { %4979 = shalt.err (!%p4976_p9)
}
  0x35   :  { %s5105_s3 = smov 64   ;;  %s5106_s11 = smov 4  }
  0x36   :  { %84 = dma.hbm_to_vmem [thread:$0]  %s5371_s5, 2048, %s79_s18, [#allocation12], %s5105_s3, %s5105_s3, %s5106_s11  }
  0x37   :  { %s5107_s16 = smov [#allocation2]   ;;  %s4980_s21 = scalar_lea.hbm %s5366_s0, 768 }
  0x38   :  { %s22_s17 = sshll.u32 %s5107_s16, 4  ;;  %p4981_p10 = scmp.ne.s32.totalorder %s5366_s0, %s4980_s21  ;;  %s23_s17 = int_to_ptr.vmem [resolvable:$true] %s22_s17 }
  0x39   :  { %p4984_p11 = scmp.lt.u32.totalorder %s4980_s21, %s5366_s0 }
  0x3b   :  { %p4986_p12 = pnand %p4984_p11, %p4981_p10 }
  0x3d   :  { %4989 = shalt.err (!%p4986_p12)
}
  0x3e   :  { %s4990_s1 = scalar_lea.vmem %s23_s17, 768  ;;  %s4994_s5 = scalar_lea.vmem %s23_s17, 3072 }
  0x3f   :  { %p4991_p13 = scmp.ne.s32.totalorder %s23_s17, %s4990_s1  ;;  %p4995_p0 = scmp.lt.s32.totalorder %s23_s17, %s23_s17 }
  0x40   :  { %p4996_p1 = scmp.lt.s32.totalorder %s4994_s5, %s4990_s1 }
  0x42   :  { %p4997_p2 = por %p4996_p1, %p4995_p0 }
  0x44   :  { %p4998_p3 = pnand %p4997_p2, %p4991_p13 }
  0x46   :  { %5001 = shalt.err (!%p4998_p3)
}
  0x47   :  { %s5108_s18 = smov 768   ;;  %s5109_s25 = smov 48  }
  0x48   :  { %28 = dma.hbm_to_vmem [thread:$0]  %s5366_s0, 768, %s23_s17, [#allocation3], %s5108_s18, %s5108_s18, %s5109_s25  }
  0x49   :  { %s5110_s29 = smov [#allocation7]   ;;  %s5111_s8 = smov [#allocation10]  }
  0x4a   :  { %s47_s30 = sshll.u32 %s5110_s29, 4  ;;  %s69_s9 = sshll.u32 %s5111_s8, 4  ;;  %s48_s30 = int_to_ptr.vmem [resolvable:$true] %s47_s30  ;;  %s70_s9 = int_to_ptr.vmem [resolvable:$true] %s69_s9 }
  0x4b   :  { %s5002_s14 = scalar_lea.hbm %s5368_s2, 32 }
  0x4c   :  { %p5003_p4 = scmp.ne.s32.totalorder %s5368_s2, %s5002_s14  ;;  %p5006_p5 = scmp.lt.u32.totalorder %s5002_s14, %s5368_s2 }
  0x4e   :  { %p5008_p6 = pnand %p5006_p5, %p5003_p4 }
  0x50   :  { %5011 = shalt.err (!%p5008_p6)
}
  0x51   :  { %s5012_s0 = scalar_lea.vmem %s48_s30, 32  ;;  %p5017_p8 = scmp.lt.s32.totalorder %s48_s30, %s48_s30 }
  0x52   :  { %p5013_p7 = scmp.ne.s32.totalorder %s48_s30, %s5012_s0  ;;  %p5018_p9 = scmp.lt.s32.totalorder %s5012_s0, %s5012_s0 }
  0x54   :  { %p5019_p10 = por %p5018_p9, %p5017_p8 }
  0x56   :  { %p5020_p11 = pnand %p5019_p10, %p5013_p7 }
  0x58   :  { %5023 = shalt.err (!%p5020_p11)
}
  0x59   :  { %50 = dma.hbm_to_vmem [thread:$0]  %s5368_s2, 32, %s48_s30, [#allocation6]  }
  0x5a   :  { %s5024_s21 = scalar_lea.hbm %s5370_s4, 32 }
  0x5b   :  { %p5025_p12 = scmp.ne.s32.totalorder %s5370_s4, %s5024_s21  ;;  %p5028_p13 = scmp.lt.u32.totalorder %s5024_s21, %s5370_s4 }
  0x5d   :  { %p5030_p0 = pnand %p5028_p13, %p5025_p12 }
  0x5f   :  { %5033 = shalt.err (!%p5030_p0)
}
  0x60   :  { %s5034_s1 = scalar_lea.vmem %s70_s9, 32  ;;  %p5039_p2 = scmp.lt.s32.totalorder %s70_s9, %s70_s9 }
  0x61   :  { %p5035_p1 = scmp.ne.s32.totalorder %s70_s9, %s5034_s1  ;;  %p5040_p3 = scmp.lt.s32.totalorder %s5034_s1, %s5034_s1 }
  0x63   :  { %p5041_p4 = por %p5040_p3, %p5039_p2 }
  0x65   :  { %p5042_p5 = pnand %p5041_p4, %p5035_p1 }
  0x67   :  { %5045 = shalt.err (!%p5042_p5)
}
  0x68   :  { %72 = dma.hbm_to_vmem [thread:$0]  %s5370_s4, 32, %s70_s9, [#allocation9]  }
  0x69   :  { %s5112_s18 = smov [#allocation13]   ;;  %s5046_s29 = scalar_lea.hbm %s5372_s6, 16 }
  0x6a   :  { %s91_s25 = sshll.u32 %s5112_s18, 4  ;;  %p5047_p6 = scmp.ne.s32.totalorder %s5372_s6, %s5046_s29  ;;  %s92_s25 = int_to_ptr.vmem [resolvable:$true] %s91_s25 }
  0x6b   :  { %p5050_p7 = scmp.lt.u32.totalorder %s5046_s29, %s5372_s6 }
  0x6d   :  { %p5052_p8 = pnand %p5050_p7, %p5047_p6 }
  0x6f   :  { %5055 = shalt.err (!%p5052_p8)
}
  0x70   :  { %s5056_s14 = scalar_lea.vmem %s92_s25, 16  ;;  %s5060_s4 = scalar_lea.vmem %s92_s25, 32 }
  0x71   :  { %p5057_p9 = scmp.ne.s32.totalorder %s92_s25, %s5056_s14  ;;  %p5061_p10 = scmp.lt.s32.totalorder %s92_s25, %s92_s25 }
  0x72   :  { %p5062_p11 = scmp.lt.s32.totalorder %s5060_s4, %s5056_s14 }
  0x74   :  { %p5063_p12 = por %p5062_p11, %p5061_p10 }
  0x76   :  { %p5064_p13 = pnand %p5063_p12, %p5057_p9 }
  0x78   :  { %5067 = shalt.err (!%p5064_p13)
}
  0x79   :  { %94 = dma.hbm_to_vmem [thread:$0]  %s5372_s6, 16, %s92_s25, [#allocation12]  }
  0x7a   :  { %5090 = dma.done.wait [#allocation3], 3072  }
  0x7b   :  { %5091 = vsyncadd [#allocation3], 4294964224 }
  0x7c   :  { %5092 = dma.done.wait [#allocation6], 49184  }
  0x7d   :  { %5093 = vsyncadd [#allocation6], 4294918112 }
  0x7e   :  { %5094 = dma.done.wait [#allocation9], 4128  }
  0x7f   :  { %5095 = vsyncadd [#allocation9], 4294963168 }
  0x80   :  { %5096 = dma.done.wait [#allocation12], 2064  }
  0x81   :  { %5097 = vsyncadd [#allocation12], 4294965232  ;;  %v4238_v0 = vld [vmem:[#allocation5 + $0x4] ss:$8 sps:$4 sm:$0xff]   ;;  %v4242_v2 = vld [vmem:[#allocation5] ss:$8 sps:$4 sm:$0xff]   ;;  %v172_v40 = vlaneseq }
  0x82   :  { %v4240_v1 = vld [vmem:[#allocation5 + $0x504] ss:$8 sps:$4 sm:$0xff]   ;;  %2745 = vmatprep.subr.bf16.mxu1 %v4238_v0  ;;  %v4243_v3 = vld [vmem:[#allocation5 + $0x500] ss:$8 sps:$4 sm:$0xff]   ;;  %v4244_v4 = vld [vmem:[#allocation5 + $0x14] ss:$8 sps:$4 sm:$0xff]  }
  0x83   :  { %2950 = vmatprep.subr.bf16.mxu0 %v4240_v1  ;;  %2746 = vmatpush1.bf16.msra.mxu1 %v4242_v2  ;;  %v4246_v5 = vld [vmem:[#allocation5 + $0x514] ss:$8 sps:$4 sm:$0xff]   ;;  %v4248_v6 = vld [vmem:[#allocation5 + $0x10] ss:$8 sps:$4 sm:$0xff]   ;;  %v4250_v8 = vld [vmem:[#allocation5 + $0x24] ss:$8 sps:$4 sm:$0xff]  }
  0x84   :  { %2951 = vmatpush1.bf16.msra.mxu0 %v4243_v3  ;;  %2747 = vmatprep.subr.bf16.mxu1 %v4244_v4  ;;  %v4249_v7 = vld [vmem:[#allocation5 + $0x510] ss:$8 sps:$4 sm:$0xff]   ;;  %v4252_v9 = vld [vmem:[#allocation5 + $0x524] ss:$8 sps:$4 sm:$0xff]   ;;  %v4254_v10 = vld [vmem:[#allocation5 + $0x20] ss:$8 sps:$4 sm:$0xff]  }
  0x85   :  { %2952 = vmatprep.subr.bf16.mxu0 %v4246_v5  ;;  %v4255_v11 = vld [vmem:[#allocation5 + $0x520] ss:$8 sps:$4 sm:$0xff]   ;;  %v4256_v12 = vld [vmem:[#allocation5 + $0x34] ss:$8 sps:$4 sm:$0xff]   ;;  %v4260_v14 = vld [vmem:[#allocation5 + $0x30] ss:$8 sps:$4 sm:$0xff]  }
  0x86   :  { %v4258_v13 = vld [vmem:[#allocation5 + $0x534] ss:$8 sps:$4 sm:$0xff]   ;;  %v4261_v15 = vld [vmem:[#allocation5 + $0x530] ss:$8 sps:$4 sm:$0xff]   ;;  %v4262_v16 = vld [vmem:[#allocation5 + $0x44] ss:$8 sps:$4 sm:$0xff]  }
  0x87   :  { %2748 = vmatpush1.bf16.msra.mxu1 %v4248_v6  ;;  %v4264_v17 = vld [vmem:[#allocation5 + $0x544] ss:$8 sps:$4 sm:$0xff]   ;;  %v4266_v18 = vld [vmem:[#allocation5 + $0x40] ss:$8 sps:$4 sm:$0xff]   ;;  %v4268_v20 = vld [vmem:[#allocation5 + $0x54] ss:$8 sps:$4 sm:$0xff]  }
  0x88   :  { %2953 = vmatpush1.bf16.msra.mxu0 %v4249_v7  ;;  %2749 = vmatprep.subr.bf16.mxu1 %v4250_v8  ;;  %v4267_v19 = vld [vmem:[#allocation5 + $0x540] ss:$8 sps:$4 sm:$0xff]   ;;  %v4270_v21 = vld [vmem:[#allocation5 + $0x554] ss:$8 sps:$4 sm:$0xff]   ;;  %v4272_v22 = vld [vmem:[#allocation5 + $0x50] ss:$8 sps:$4 sm:$0xff]  }
  0x89   :  { %2954 = vmatprep.subr.bf16.mxu0 %v4252_v9  ;;  %v4273_v23 = vld [vmem:[#allocation5 + $0x550] ss:$8 sps:$4 sm:$0xff]   ;;  %v4274_v24 = vld [vmem:[#allocation5 + $0x64] ss:$8 sps:$4 sm:$0xff]   ;;  %v4278_v26 = vld [vmem:[#allocation5 + $0x60] ss:$8 sps:$4 sm:$0xff]  }
  0x8a   :  { %v4276_v25 = vld [vmem:[#allocation5 + $0x564] ss:$8 sps:$4 sm:$0xff]   ;;  %v4279_v27 = vld [vmem:[#allocation5 + $0x560] ss:$8 sps:$4 sm:$0xff]   ;;  %v4280_v28 = vld [vmem:[#allocation5 + $0x74] ss:$8 sps:$4 sm:$0xff]  }
  0x8b   :  { %2750 = vmatpush1.bf16.msra.mxu1 %v4254_v10  ;;  %v4282_v29 = vld [vmem:[#allocation5 + $0x574] ss:$8 sps:$4 sm:$0xff]   ;;  %v4284_v30 = vld [vmem:[#allocation5 + $0x70] ss:$8 sps:$4 sm:$0xff]   ;;  %v4286_v32 = vld [vmem:[#allocation5 + $0x84] ss:$8 sps:$4 sm:$0xff]  }
  0x8c   :  { %2955 = vmatpush1.bf16.msra.mxu0 %v4255_v11  ;;  %2751 = vmatprep.subr.bf16.mxu1 %v4256_v12  ;;  %v4285_v31 = vld [vmem:[#allocation5 + $0x570] ss:$8 sps:$4 sm:$0xff]   ;;  %v4288_v33 = vld [vmem:[#allocation5 + $0x584] ss:$8 sps:$4 sm:$0xff]   ;;  %v4290_v34 = vld [vmem:[#allocation5 + $0x80] ss:$8 sps:$4 sm:$0xff]  }
  0x8d   :  { %2956 = vmatprep.subr.bf16.mxu0 %v4258_v13  ;;  %v4291_v35 = vld [vmem:[#allocation5 + $0x580] ss:$8 sps:$4 sm:$0xff]   ;;  %v4292_v36 = vld [vmem:[#allocation5 + $0x94] ss:$8 sps:$4 sm:$0xff]   ;;  %v5113_v38 = vmov 1983009808  }
  0x8e   :  { %v4294_v37 = vld [vmem:[#allocation5 + $0x594] ss:$8 sps:$4 sm:$0xff]   ;;  %v170_v39 = vunpack.c.l.s4 %v5113_v38  ;;  %v4296_v41 = vld [vmem:[#allocation5 + $0x90] ss:$8 sps:$4 sm:$0xff]   ;;  %v4298_v43 = vld [vmem:[#allocation5 + $0xa4] ss:$8 sps:$4 sm:$0xff]  }
  0x8f   :  { %2752 = vmatpush1.bf16.msra.mxu1 %v4260_v14  ;;  %v4297_v42 = vld [vmem:[#allocation5 + $0x590] ss:$8 sps:$4 sm:$0xff]   ;;  %v4300_v44 = vld [vmem:[#allocation5 + $0x5a4] ss:$8 sps:$4 sm:$0xff]   ;;  %v5242_v46 = vshrl.u32 %v172_v40, 7 }
  0x90   :  { %2957 = vmatpush1.bf16.msra.mxu0 %v4261_v15  ;;  %2753 = vmatprep.subr.bf16.mxu1 %v4262_v16  ;;  %v171_v45 = vunpack.c.0.s8 %v170_v39  ;;  %v4302_v47 = vld [vmem:[#allocation5 + $0xa0] ss:$8 sps:$4 sm:$0xff]   ;;  %v4304_v49 = vld [vmem:[#allocation5 + $0xb4] ss:$8 sps:$4 sm:$0xff]   ;;  %v4308_v51 = vld [vmem:[#allocation5 + $0xb0] ss:$8 sps:$4 sm:$0xff]  }
  0x91   :  { %2958 = vmatprep.subr.bf16.mxu0 %v4264_v17  ;;  %v4303_v48 = vld [vmem:[#allocation5 + $0x5a0] ss:$8 sps:$4 sm:$0xff]   ;;  %v4306_v50 = vld [vmem:[#allocation5 + $0x5b4] ss:$8 sps:$4 sm:$0xff]   ;;  %v4309_v52 = vld [vmem:[#allocation5 + $0x5b0] ss:$8 sps:$4 sm:$0xff]  }
  0x92   :  { %v5245_v53 = vsub.s32 %v171_v45, %v5242_v46  ;;  %v4310_v54 = vld [vmem:[#allocation5 + $0xc4] ss:$8 sps:$4 sm:$0xff]   ;;  %v4334_v55 = vld [vmem:[#allocation2] ss:$48 sps:$4 sm:$0xff]   ;;  %v4316_v62 = vld [vmem:[#allocation5 + $0xd4] ss:$8 sps:$4 sm:$0xff]  }
  0x93   :  { %2754 = vmatpush1.bf16.msra.mxu1 %v4266_v18  ;;  %v4337_v56 = vld [vmem:[#allocation2 + $0x60] ss:$48 sps:$4 sm:$0xff]   ;;  %v4312_v57 = vld [vmem:[#allocation5 + $0x5c4] ss:$8 sps:$4 sm:$0xff]   ;;  %v4318_v63 = vld [vmem:[#allocation5 + $0x5d4] ss:$8 sps:$4 sm:$0xff]  }
  0x94   :  { %2959 = vmatpush1.bf16.msra.mxu0 %v4267_v19  ;;  %2755 = vmatprep.subr.bf16.mxu1 %v4268_v20  ;;  %v4314_v58 = vld [vmem:[#allocation5 + $0xc0] ss:$8 sps:$4 sm:$0xff]   ;;  %v175_v60 = vrot.slane %v4334_v55, %v5245_v53  ;;  %v189_v61 = vrot.slane %v4337_v56, %v5245_v53  ;;  %v4345_v1 = vld [vmem:[#allocation2 + $0x14] ss:$48 sps:$4 sm:$0xff]   ;;  %v4320_v5 = vld [vmem:[#allocation5 + $0xd0] ss:$8 sps:$4 sm:$0xff]  }
  0x95   :  { %2960 = vmatprep.subr.bf16.mxu0 %v4270_v21  ;;  %v4315_v59 = vld [vmem:[#allocation5 + $0x5c0] ss:$8 sps:$4 sm:$0xff]   ;;  %v4348_v2 = vld [vmem:[#allocation2 + $0x74] ss:$48 sps:$4 sm:$0xff]   ;;  %v254_v4 = vrot.slane %v4345_v1, %v5245_v53  ;;  %v4321_v6 = vld [vmem:[#allocation5 + $0x5d0] ss:$8 sps:$4 sm:$0xff]  }
  0x96   :  { %v198_v0 = vcombine.high %v175_v60, %v189_v61  ;;  %v268_v7 = vrot.slane %v4348_v2, %v5245_v53  ;;  %v4322_v8 = vld [vmem:[#allocation5 + $0xe4] ss:$8 sps:$4 sm:$0xff]   ;;  %v4326_v13 = vld [vmem:[#allocation5 + $0xe0] ss:$8 sps:$4 sm:$0xff]   ;;  %v4328_v16 = vld [vmem:[#allocation5 + $0xf4] ss:$8 sps:$4 sm:$0xff]  }
  0x97   :  { %2756 = vmatpush1.bf16.msra.mxu1 %v4272_v22  ;;  %v4324_v9 = vld [vmem:[#allocation5 + $0x5e4] ss:$8 sps:$4 sm:$0xff]   ;;  %v4327_v14 = vld [vmem:[#allocation5 + $0x5e0] ss:$8 sps:$4 sm:$0xff]   ;;  %v4330_v17 = vld [vmem:[#allocation5 + $0x5f4] ss:$8 sps:$4 sm:$0xff]   ;;  %v197_v22 = vcombine.low %v175_v60, %v189_v61 }
  0x98   :  { %2961 = vmatpush1.bf16.msra.mxu0 %v4273_v23  ;;  %2757 = vmatprep.subr.bf16.mxu1 %v4274_v24  ;;  %v406_v3 = vpack.c.bf16 %v198_v0, %v198_v0  ;;  %v272_v10 = vcombine.high %v254_v4, %v268_v7  ;;  %v4336_v11 = vld [vmem:[#allocation2 + $0x4] ss:$48 sps:$4 sm:$0xff]   ;;  %v4332_v20 = vld [vmem:[#allocation5 + $0xf0] ss:$8 sps:$4 sm:$0xff]   ;;  %v271_v23 = vcombine.low %v254_v4, %v268_v7  ;;  %v4358_v38 = vld [vmem:[#allocation5 + $0x120] ss:$8 sps:$4 sm:$0xff]  }
  0x99   :  { %2962 = vmatprep.subr.bf16.mxu0 %v4276_v25  ;;  %v4339_v12 = vld [vmem:[#allocation2 + $0x64] ss:$48 sps:$4 sm:$0xff]   ;;  %v5252_v18 = vrot.slane %v4336_v11, %v5245_v53  ;;  %v4333_v21 = vld [vmem:[#allocation5 + $0x5f0] ss:$8 sps:$4 sm:$0xff]   ;;  %v4361_v39 = vld [vmem:[#allocation5 + $0x620] ss:$8 sps:$4 sm:$0xff]  }
  0x9a   :  { %2777 = vmatprep.mubr.bf16.mxu1 %v406_v3  ;;  %v416_v15 = vpack.c.bf16 %v272_v10, %v272_v10  ;;  %v5255_v19 = vrot.slane %v4339_v12, %v5245_v53  ;;  %v4342_v24 = vld [vmem:[#allocation5 + $0x104] ss:$8 sps:$4 sm:$0xff]   ;;  %v4366_v40 = vld [vmem:[#allocation5 + $0x134] ss:$8 sps:$4 sm:$0xff]   ;;  %v4382_v56 = vld [vmem:[#allocation5 + $0x160] ss:$8 sps:$4 sm:$0xff]  }
  0x9b   :  { %2758 = vmatpush1.bf16.msra.mxu1 %v4278_v26  ;;  %v4351_v25 = vld [vmem:[#allocation5 + $0x604] ss:$8 sps:$4 sm:$0xff]   ;;  %v4388_v60 = vld [vmem:[#allocation5 + $0x170] ss:$8 sps:$4 sm:$0xff]   ;;  %v4394_v4 = vld [vmem:[#allocation5 + $0x180] ss:$8 sps:$4 sm:$0xff]  }
  0x9c   :  { %2963 = vmatpush1.bf16.msra.mxu0 %v4279_v27  ;;  %2759 = vmatprep.subr.bf16.mxu1 %v4280_v28  ;;  %v200_v26 = vcombine.high %v5252_v18, %v5255_v19  ;;  %v4340_v27 = vld [vmem:[#allocation5 + $0x100] ss:$8 sps:$4 sm:$0xff]   ;;  %v4375_v45 = vld [vmem:[#allocation5 + $0x644] ss:$8 sps:$4 sm:$0xff]   ;;  %v4391_v61 = vld [vmem:[#allocation5 + $0x670] ss:$8 sps:$4 sm:$0xff]  }
  0x9d   :  { %2964 = vmatprep.subr.bf16.mxu0 %v4282_v29  ;;  %2982 = vmatprep.mubr.bf16.mxu0 %v416_v15  ;;  %v4349_v28 = vld [vmem:[#allocation5 + $0x600] ss:$8 sps:$4 sm:$0xff]   ;;  %v405_v29 = vpack.c.bf16 %v197_v22, %v197_v22  ;;  %v4387_v55 = vld [vmem:[#allocation5 + $0x664] ss:$8 sps:$4 sm:$0xff]   ;;  %v4405_v7 = vld [vmem:[#allocation5 + $0x694] ss:$8 sps:$4 sm:$0xff]  }
  0x9e   :  { %v4445_v0 = vld [vmem:[#allocation2 + $0x18] ss:$48 sps:$4 sm:$0xff]   ;;  %v4408_v12 = vld [vmem:[#allocation5 + $0x1a4] ss:$8 sps:$4 sm:$0xff]  }
  0x9f   :  { %2760 = vmatpush1.bf16.msra.mxu1 %v4284_v30  ;;  %v415_v30 = vpack.c.bf16 %v271_v23, %v271_v23  ;;  %v4447_v1 = vld [vmem:[#allocation2 + $0x78] ss:$48 sps:$4 sm:$0xff]   ;;  %v283_v2 = vrot.slane %v4445_v0, %v5245_v53  ;;  %v4420_v22 = vld [vmem:[#allocation5 + $0x1c4] ss:$8 sps:$4 sm:$0xff]  }
  0xa0   :  { %2965 = vmatpush1.bf16.msra.mxu0 %v4285_v31  ;;  %2761 = vmatprep.subr.bf16.mxu1 %v4286_v32  ;;  %v4354_v31 = vld [vmem:[#allocation5 + $0x114] ss:$8 sps:$4 sm:$0xff]   ;;  %v297_v3 = vrot.slane %v4447_v1, %v5245_v53  ;;  %v4400_v10 = vld [vmem:[#allocation5 + $0x190] ss:$8 sps:$4 sm:$0xff]   ;;  %v4409_v15 = vld [vmem:[#allocation5 + $0x6a0] ss:$8 sps:$4 sm:$0xff]  }
  0xa1   :  { %2966 = vmatprep.subr.bf16.mxu0 %v4288_v33  ;;  %v4357_v32 = vld [vmem:[#allocation5 + $0x614] ss:$8 sps:$4 sm:$0xff]   ;;  %v408_v33 = vpack.c.bf16 %v200_v26, %v200_v26  ;;  %v4403_v11 = vld [vmem:[#allocation5 + $0x690] ss:$8 sps:$4 sm:$0xff]   ;;  %v4423_v23 = vld [vmem:[#allocation5 + $0x6c4] ss:$8 sps:$4 sm:$0xff]  }
  0xa2   :  { %v4426_v26 = vld [vmem:[#allocation5 + $0x1d4] ss:$8 sps:$4 sm:$0xff]   ;;  %v4472_v1 = vld [vmem:[#allocation5 + $0x244] ss:$8 sps:$4 sm:$0xff]  }
  0xa3   :  { %2762 = vmatpush1.bf16.msra.mxu1 %v4290_v34  ;;  %v4352_v34 = vld [vmem:[#allocation5 + $0x110] ss:$8 sps:$4 sm:$0xff]  }
  0xa4   :  { %2967 = vmatpush1.bf16.msra.mxu0 %v4291_v35  ;;  %2763 = vmatprep.subr.bf16.mxu1 %v4292_v36  ;;  %v4355_v35 = vld [vmem:[#allocation5 + $0x610] ss:$8 sps:$4 sm:$0xff]   ;;  %v4360_v36 = vld [vmem:[#allocation5 + $0x124] ss:$8 sps:$4 sm:$0xff]  }
  0xa5   :  { %2968 = vmatprep.subr.bf16.mxu0 %v4294_v37  ;;  %v4363_v37 = vld [vmem:[#allocation5 + $0x624] ss:$8 sps:$4 sm:$0xff]  }
  0xa7   :  { %2764 = vmatpush1.bf16.msra.mxu1 %v4296_v41  ;;  %v4369_v41 = vld [vmem:[#allocation5 + $0x634] ss:$8 sps:$4 sm:$0xff]  }
  0xa8   :  { %2969 = vmatpush1.bf16.msra.mxu0 %v4297_v42  ;;  %2765 = vmatprep.subr.bf16.mxu1 %v4298_v43  ;;  %v4364_v42 = vld [vmem:[#allocation5 + $0x130] ss:$8 sps:$4 sm:$0xff]  }
  0xa9   :  { %2970 = vmatprep.subr.bf16.mxu0 %v4300_v44  ;;  %v4367_v43 = vld [vmem:[#allocation5 + $0x630] ss:$8 sps:$4 sm:$0xff]   ;;  %v4372_v44 = vld [vmem:[#allocation5 + $0x144] ss:$8 sps:$4 sm:$0xff]  }
  0xab   :  { %2766 = vmatpush1.bf16.msra.mxu1 %v4302_v47  ;;  %v4370_v47 = vld [vmem:[#allocation5 + $0x140] ss:$8 sps:$4 sm:$0xff]  }
  0xac   :  { %2971 = vmatpush1.bf16.msra.mxu0 %v4303_v48  ;;  %2767 = vmatprep.subr.bf16.mxu1 %v4304_v49  ;;  %v4373_v48 = vld [vmem:[#allocation5 + $0x640] ss:$8 sps:$4 sm:$0xff]   ;;  %v4378_v49 = vld [vmem:[#allocation5 + $0x154] ss:$8 sps:$4 sm:$0xff]  }
  0xad   :  { %2972 = vmatprep.subr.bf16.mxu0 %v4306_v50  ;;  %v4381_v50 = vld [vmem:[#allocation5 + $0x654] ss:$8 sps:$4 sm:$0xff]  }
  0xaf   :  { %2768 = vmatpush1.bf16.msra.mxu1 %v4308_v51  ;;  %v4376_v51 = vld [vmem:[#allocation5 + $0x150] ss:$8 sps:$4 sm:$0xff]  }
  0xb0   :  { %2973 = vmatpush1.bf16.msra.mxu0 %v4309_v52  ;;  %2769 = vmatprep.subr.bf16.mxu1 %v4310_v54  ;;  %v4379_v52 = vld [vmem:[#allocation5 + $0x650] ss:$8 sps:$4 sm:$0xff]   ;;  %v4384_v54 = vld [vmem:[#allocation5 + $0x164] ss:$8 sps:$4 sm:$0xff]  }
  0xb1   :  { %2974 = vmatprep.subr.bf16.mxu0 %v4312_v57  ;;  %v4385_v57 = vld [vmem:[#allocation5 + $0x660] ss:$8 sps:$4 sm:$0xff]  }
  0xb3   :  { %2770 = vmatpush1.bf16.msra.mxu1 %v4314_v58  ;;  %v4390_v58 = vld [vmem:[#allocation5 + $0x174] ss:$8 sps:$4 sm:$0xff]  }
  0xb4   :  { %2975 = vmatpush1.bf16.msra.mxu0 %v4315_v59  ;;  %2771 = vmatprep.subr.bf16.mxu1 %v4316_v62  ;;  %v4393_v59 = vld [vmem:[#allocation5 + $0x674] ss:$8 sps:$4 sm:$0xff]   ;;  %v4396_v62 = vld [vmem:[#allocation5 + $0x184] ss:$8 sps:$4 sm:$0xff]  }
  0xb5   :  { %2976 = vmatprep.subr.bf16.mxu0 %v4318_v63  ;;  %v4399_v63 = vld [vmem:[#allocation5 + $0x684] ss:$8 sps:$4 sm:$0xff]  }
  0xb7   :  { %2772 = vmatpush1.bf16.msra.mxu1 %v4320_v5  ;;  %v4397_v5 = vld [vmem:[#allocation5 + $0x680] ss:$8 sps:$4 sm:$0xff]  }
  0xb8   :  { %2977 = vmatpush1.bf16.msra.mxu0 %v4321_v6  ;;  %2773 = vmatprep.subr.bf16.mxu1 %v4322_v8  ;;  %v4402_v6 = vld [vmem:[#allocation5 + $0x194] ss:$8 sps:$4 sm:$0xff]   ;;  %v306_v8 = vcombine.high %v283_v2, %v297_v3 }
  0xb9   :  { %2978 = vmatprep.subr.bf16.mxu0 %v4324_v9 }
  0xba   :  { %v418_v9 = vpack.c.bf16 %v306_v8, %v306_v8  ;;  %v4473_v8 = vld [vmem:[#allocation5 + $0x740] ss:$8 sps:$4 sm:$0xff]  }
  0xbb   :  { %2774 = vmatpush1.bf16.msra.mxu1 %v4326_v13  ;;  %v4411_v13 = vld [vmem:[#allocation5 + $0x6a4] ss:$8 sps:$4 sm:$0xff]  }
  0xbc   :  { %2979 = vmatpush1.bf16.msra.mxu0 %v4327_v14  ;;  %2775 = vmatprep.subr.bf16.mxu1 %v4328_v16  ;;  %v4406_v14 = vld [vmem:[#allocation5 + $0x1a0] ss:$8 sps:$4 sm:$0xff]   ;;  %v4414_v16 = vld [vmem:[#allocation5 + $0x1b4] ss:$8 sps:$4 sm:$0xff]  }
  0xbd   :  { %2980 = vmatprep.subr.bf16.mxu0 %v4330_v17  ;;  %v4417_v17 = vld [vmem:[#allocation5 + $0x6b4] ss:$8 sps:$4 sm:$0xff]  }
  0xbf   :  { %2776 = vmatpush1.bf16.msra.mxu1 %v4332_v20  ;;  %v4412_v20 = vld [vmem:[#allocation5 + $0x1b0] ss:$8 sps:$4 sm:$0xff]  }
  0xc0   :  { %2981 = vmatpush1.bf16.msra.mxu0 %v4333_v21  ;;  %2786 = vmatprep.subr.bf16.mxu1 %v4342_v24  ;;  %v4415_v21 = vld [vmem:[#allocation5 + $0x6b0] ss:$8 sps:$4 sm:$0xff]   ;;  %v4418_v24 = vld [vmem:[#allocation5 + $0x1c0] ss:$8 sps:$4 sm:$0xff]  }
  0xc1   :  { %2991 = vmatprep.subr.bf16.mxu0 %v4351_v25  ;;  %v4421_v25 = vld [vmem:[#allocation5 + $0x6c0] ss:$8 sps:$4 sm:$0xff]  }
  0xc2   :  { %2778 = vmatmul.mubr.bf16.vlgmr.msra.gmra.mrb[0].mxu1 %v405_v29  ;;  %v4427_v29 = vld [vmem:[#allocation5 + $0x6d0] ss:$8 sps:$4 sm:$0xff]  }
  0xc3   :  { %2983 = vmatmul.mubr.bf16.vlgmr.msra.gmra.mrb[0].mxu0 %v415_v30  ;;  %2787 = vmatpush1.bf16.msra.mxu1 %v4340_v27  ;;  %v4429_v27 = vld [vmem:[#allocation5 + $0x6d4] ss:$8 sps:$4 sm:$0xff]   ;;  %v4432_v30 = vld [vmem:[#allocation5 + $0x1e4] ss:$8 sps:$4 sm:$0xff]  }
  0xc4   :  { %2992 = vmatpush1.bf16.msra.mxu0 %v4349_v28  ;;  %2788 = vmatprep.subr.bf16.mxu1 %v4354_v31  ;;  %v4424_v28 = vld [vmem:[#allocation5 + $0x1d0] ss:$8 sps:$4 sm:$0xff]   ;;  %v4435_v31 = vld [vmem:[#allocation5 + $0x6e4] ss:$8 sps:$4 sm:$0xff]  }
  0xc5   :  { %2993 = vmatprep.subr.bf16.mxu0 %v4357_v32  ;;  %2818 = vmatprep.mubr.bf16.mxu1 %v408_v33  ;;  %v4430_v32 = vld [vmem:[#allocation5 + $0x1e0] ss:$8 sps:$4 sm:$0xff]  }
  0xc6   :  { %3023 = vmatprep.mubr.bf16.mxu0 %v418_v9  ;;  %v4433_v33 = vld [vmem:[#allocation5 + $0x6e0] ss:$8 sps:$4 sm:$0xff]   ;;  %v4478_v9 = vld [vmem:[#allocation5 + $0x254] ss:$8 sps:$4 sm:$0xff]  }
  0xc7   :  { %2789 = vmatpush1.bf16.msra.mxu1 %v4352_v34  ;;  %v4438_v34 = vld [vmem:[#allocation5 + $0x1f4] ss:$8 sps:$4 sm:$0xff]  }
  0xc8   :  { %2994 = vmatpush1.bf16.msra.mxu0 %v4355_v35  ;;  %2790 = vmatprep.subr.bf16.mxu1 %v4360_v36  ;;  %v4441_v35 = vld [vmem:[#allocation5 + $0x6f4] ss:$8 sps:$4 sm:$0xff]   ;;  %v199_v36 = vcombine.low %v5252_v18, %v5255_v19  ;;  %v4452_v18 = vld [vmem:[#allocation5 + $0x210] ss:$8 sps:$4 sm:$0xff]  }
  0xc9   :  { %2995 = vmatprep.subr.bf16.mxu0 %v4363_v37  ;;  %v305_v37 = vcombine.low %v283_v2, %v297_v3  ;;  %v4455_v19 = vld [vmem:[#allocation5 + $0x710] ss:$8 sps:$4 sm:$0xff]   ;;  %v4475_v2 = vld [vmem:[#allocation5 + $0x744] ss:$8 sps:$4 sm:$0xff]  }
  0xcb   :  { %2791 = vmatpush1.bf16.msra.mxu1 %v4358_v38  ;;  %v4436_v38 = vld [vmem:[#allocation5 + $0x1f0] ss:$8 sps:$4 sm:$0xff]  }
  0xcc   :  { %2996 = vmatpush1.bf16.msra.mxu0 %v4361_v39  ;;  %2792 = vmatprep.subr.bf16.mxu1 %v4366_v40  ;;  %v4439_v39 = vld [vmem:[#allocation5 + $0x6f0] ss:$8 sps:$4 sm:$0xff]   ;;  %v4444_v40 = vld [vmem:[#allocation5 + $0x204] ss:$8 sps:$4 sm:$0xff]  }
  0xcd   :  { %2997 = vmatprep.subr.bf16.mxu0 %v4369_v41  ;;  %v4451_v41 = vld [vmem:[#allocation5 + $0x704] ss:$8 sps:$4 sm:$0xff]  }
  0xcf   :  { %2793 = vmatpush1.bf16.msra.mxu1 %v4364_v42  ;;  %v407_v42 = vpack.c.bf16 %v199_v36, %v199_v36  ;;  %v4514_v36 = vld [vmem:[#allocation5 + $0x2b4] ss:$8 sps:$4 sm:$0xff]  }
  0xd0   :  { %2998 = vmatpush1.bf16.msra.mxu0 %v4367_v43  ;;  %2794 = vmatprep.subr.bf16.mxu1 %v4372_v44  ;;  %v417_v43 = vpack.c.bf16 %v305_v37, %v305_v37  ;;  %v4442_v44 = vld [vmem:[#allocation5 + $0x200] ss:$8 sps:$4 sm:$0xff]   ;;  %v4517_v37 = vld [vmem:[#allocation5 + $0x7b4] ss:$8 sps:$4 sm:$0xff]  }
  0xd1   :  { %2999 = vmatprep.subr.bf16.mxu0 %v4375_v45  ;;  %v4449_v45 = vld [vmem:[#allocation5 + $0x700] ss:$8 sps:$4 sm:$0xff]  }
  0xd3   :  { %2795 = vmatpush1.bf16.msra.mxu1 %v4370_v47  ;;  %v4454_v47 = vld [vmem:[#allocation5 + $0x214] ss:$8 sps:$4 sm:$0xff]  }
  0xd4   :  { %3000 = vmatpush1.bf16.msra.mxu0 %v4373_v48  ;;  %2796 = vmatprep.subr.bf16.mxu1 %v4378_v49  ;;  %v4457_v48 = vld [vmem:[#allocation5 + $0x714] ss:$8 sps:$4 sm:$0xff]   ;;  %v4460_v49 = vld [vmem:[#allocation5 + $0x224] ss:$8 sps:$4 sm:$0xff]  }
  0xd5   :  { %3001 = vmatprep.subr.bf16.mxu0 %v4381_v50  ;;  %v4463_v50 = vld [vmem:[#allocation5 + $0x724] ss:$8 sps:$4 sm:$0xff]  }
  0xd7   :  { %2797 = vmatpush1.bf16.msra.mxu1 %v4376_v51  ;;  %v4458_v51 = vld [vmem:[#allocation5 + $0x220] ss:$8 sps:$4 sm:$0xff]  }
  0xd8   :  { %3002 = vmatpush1.bf16.msra.mxu0 %v4379_v52  ;;  %2798 = vmatprep.subr.bf16.mxu1 %v4384_v54  ;;  %v4461_v52 = vld [vmem:[#allocation5 + $0x720] ss:$8 sps:$4 sm:$0xff]   ;;  %v4466_v54 = vld [vmem:[#allocation5 + $0x234] ss:$8 sps:$4 sm:$0xff]  }
  0xd9   :  { %3003 = vmatprep.subr.bf16.mxu0 %v4387_v55  ;;  %v4469_v55 = vld [vmem:[#allocation5 + $0x734] ss:$8 sps:$4 sm:$0xff]  }
  0xdb   :  { %2799 = vmatpush1.bf16.msra.mxu1 %v4382_v56  ;;  %v4542_v56 = vld [vmem:[#allocation2 + $0x8] ss:$48 sps:$4 sm:$0xff]  }
  0xdc   :  { %3004 = vmatpush1.bf16.msra.mxu0 %v4385_v57  ;;  %2800 = vmatprep.subr.bf16.mxu1 %v4390_v58  ;;  %v4544_v57 = vld [vmem:[#allocation2 + $0x68] ss:$48 sps:$4 sm:$0xff]   ;;  %v5264_v58 = vrot.slane %v4542_v56, %v5245_v53  ;;  %v4538_v56 = vld [vmem:[#allocation5 + $0x2f4] ss:$8 sps:$4 sm:$0xff]  }
  0xdd   :  { %3005 = vmatprep.subr.bf16.mxu0 %v4393_v59  ;;  %v4549_v59 = vld [vmem:[#allocation2 + $0x1c] ss:$48 sps:$4 sm:$0xff]  }
  0xde   :  { %v5270_v0 = vrot.slane %v4549_v59, %v5245_v53 }
  0xdf   :  { %2801 = vmatpush1.bf16.msra.mxu1 %v4388_v60  ;;  %v5267_v60 = vrot.slane %v4544_v57, %v5245_v53  ;;  %v4541_v57 = vld [vmem:[#allocation5 + $0x7f4] ss:$8 sps:$4 sm:$0xff]  }
  0xe0   :  { %3006 = vmatpush1.bf16.msra.mxu0 %v4391_v61  ;;  %2802 = vmatprep.subr.bf16.mxu1 %v4396_v62  ;;  %v4550_v61 = vld [vmem:[#allocation2 + $0x7c] ss:$48 sps:$4 sm:$0xff]   ;;  %v4464_v62 = vld [vmem:[#allocation5 + $0x230] ss:$8 sps:$4 sm:$0xff]  }
  0xe1   :  { %3007 = vmatprep.subr.bf16.mxu0 %v4399_v63  ;;  %v4467_v63 = vld [vmem:[#allocation5 + $0x730] ss:$8 sps:$4 sm:$0xff]   ;;  %v234_v3 = vcombine.high %v5264_v58, %v5267_v60 }
  0xe3   :  { %2803 = vmatpush1.bf16.msra.mxu1 %v4394_v4  ;;  %v5275_v4 = vrot.slane %v4550_v61, %v5245_v53 }
  0xe4   :  { %3008 = vmatpush1.bf16.msra.mxu0 %v4397_v5  ;;  %2804 = vmatprep.subr.bf16.mxu1 %v4402_v6  ;;  %v410_v5 = vpack.c.bf16 %v234_v3, %v234_v3  ;;  %v4536_v3 = vld [vmem:[#allocation5 + $0x2f0] ss:$8 sps:$4 sm:$0xff]  }
  0xe5   :  { %3009 = vmatprep.subr.bf16.mxu0 %v4405_v7  ;;  %v308_v6 = vcombine.high %v5270_v0, %v5275_v4  ;;  %v4470_v7 = vld [vmem:[#allocation5 + $0x240] ss:$8 sps:$4 sm:$0xff]  }
  0xe7   :  { %2805 = vmatpush1.bf16.msra.mxu1 %v4400_v10  ;;  %v4481_v10 = vld [vmem:[#allocation5 + $0x754] ss:$8 sps:$4 sm:$0xff]  }
  0xe8   :  { %3010 = vmatpush1.bf16.msra.mxu0 %v4403_v11  ;;  %2806 = vmatprep.subr.bf16.mxu1 %v4408_v12  ;;  %v420_v11 = vpack.c.bf16 %v308_v6, %v308_v6  ;;  %v4476_v12 = vld [vmem:[#allocation5 + $0x250] ss:$8 sps:$4 sm:$0xff]   ;;  %v4548_v6 = vld [vmem:[#allocation5 + $0x304] ss:$8 sps:$4 sm:$0xff]  }
  0xe9   :  { %3011 = vmatprep.subr.bf16.mxu0 %v4411_v13  ;;  %v4479_v13 = vld [vmem:[#allocation5 + $0x750] ss:$8 sps:$4 sm:$0xff]  }
  0xeb   :  { %2807 = vmatpush1.bf16.msra.mxu1 %v4406_v14  ;;  %v4484_v14 = vld [vmem:[#allocation5 + $0x264] ss:$8 sps:$4 sm:$0xff]  }
  0xec   :  { %3012 = vmatpush1.bf16.msra.mxu0 %v4409_v15  ;;  %2808 = vmatprep.subr.bf16.mxu1 %v4414_v16  ;;  %v4487_v15 = vld [vmem:[#allocation5 + $0x764] ss:$8 sps:$4 sm:$0xff]   ;;  %v4482_v16 = vld [vmem:[#allocation5 + $0x260] ss:$8 sps:$4 sm:$0xff]  }
  0xed   :  { %3013 = vmatprep.subr.bf16.mxu0 %v4417_v17  ;;  %v4485_v17 = vld [vmem:[#allocation5 + $0x760] ss:$8 sps:$4 sm:$0xff]  }
  0xef   :  { %2809 = vmatpush1.bf16.msra.mxu1 %v4412_v20  ;;  %v4490_v20 = vld [vmem:[#allocation5 + $0x274] ss:$8 sps:$4 sm:$0xff]  }
  0xf0   :  { %3014 = vmatpush1.bf16.msra.mxu0 %v4415_v21  ;;  %2810 = vmatprep.subr.bf16.mxu1 %v4420_v22  ;;  %v4493_v21 = vld [vmem:[#allocation5 + $0x774] ss:$8 sps:$4 sm:$0xff]   ;;  %v4488_v22 = vld [vmem:[#allocation5 + $0x270] ss:$8 sps:$4 sm:$0xff]  }
  0xf1   :  { %3015 = vmatprep.subr.bf16.mxu0 %v4423_v23  ;;  %v4491_v23 = vld [vmem:[#allocation5 + $0x770] ss:$8 sps:$4 sm:$0xff]  }
  0xf3   :  { %2811 = vmatpush1.bf16.msra.mxu1 %v4418_v24  ;;  %v4496_v24 = vld [vmem:[#allocation5 + $0x284] ss:$8 sps:$4 sm:$0xff]  }
  0xf4   :  { %3016 = vmatpush1.bf16.msra.mxu0 %v4421_v25  ;;  %2812 = vmatprep.subr.bf16.mxu1 %v4426_v26  ;;  %v4499_v25 = vld [vmem:[#allocation5 + $0x784] ss:$8 sps:$4 sm:$0xff]   ;;  %v4494_v26 = vld [vmem:[#allocation5 + $0x280] ss:$8 sps:$4 sm:$0xff]  }
  0xf5   :  { %3017 = vmatprep.subr.bf16.mxu0 %v4429_v27  ;;  %v4497_v27 = vld [vmem:[#allocation5 + $0x780] ss:$8 sps:$4 sm:$0xff]  }
  0xf7   :  { %2813 = vmatpush1.bf16.msra.mxu1 %v4424_v28  ;;  %v4502_v28 = vld [vmem:[#allocation5 + $0x294] ss:$8 sps:$4 sm:$0xff]  }
  0xf8   :  { %3018 = vmatpush1.bf16.msra.mxu0 %v4427_v29  ;;  %2814 = vmatprep.subr.bf16.mxu1 %v4432_v30  ;;  %v4505_v29 = vld [vmem:[#allocation5 + $0x794] ss:$8 sps:$4 sm:$0xff]   ;;  %v4500_v30 = vld [vmem:[#allocation5 + $0x290] ss:$8 sps:$4 sm:$0xff]  }
  0xf9   :  { %3019 = vmatprep.subr.bf16.mxu0 %v4435_v31  ;;  %v4503_v31 = vld [vmem:[#allocation5 + $0x790] ss:$8 sps:$4 sm:$0xff]  }
  0xfb   :  { %2815 = vmatpush1.bf16.msra.mxu1 %v4430_v32  ;;  %v4508_v32 = vld [vmem:[#allocation5 + $0x2a4] ss:$8 sps:$4 sm:$0xff]  }
  0xfc   :  { %3020 = vmatpush1.bf16.msra.mxu0 %v4433_v33  ;;  %2816 = vmatprep.subr.bf16.mxu1 %v4438_v34  ;;  %v4511_v33 = vld [vmem:[#allocation5 + $0x7a4] ss:$8 sps:$4 sm:$0xff]   ;;  %v4506_v34 = vld [vmem:[#allocation5 + $0x2a0] ss:$8 sps:$4 sm:$0xff]  }
  0xfd   :  { %3021 = vmatprep.subr.bf16.mxu0 %v4441_v35  ;;  %v4509_v35 = vld [vmem:[#allocation5 + $0x7a0] ss:$8 sps:$4 sm:$0xff]  }
  0xff   :  { %2817 = vmatpush1.bf16.msra.mxu1 %v4436_v38  ;;  %v4512_v38 = vld [vmem:[#allocation5 + $0x2b0] ss:$8 sps:$4 sm:$0xff]  }
 0x100   :  { %3022 = vmatpush1.bf16.msra.mxu0 %v4439_v39  ;;  %2827 = vmatprep.subr.bf16.mxu1 %v4444_v40  ;;  %v4515_v39 = vld [vmem:[#allocation5 + $0x7b0] ss:$8 sps:$4 sm:$0xff]   ;;  %v4520_v40 = vld [vmem:[#allocation5 + $0x2c4] ss:$8 sps:$4 sm:$0xff]  }
 0x101   :  { %3032 = vmatprep.subr.bf16.mxu0 %v4451_v41  ;;  %v4523_v41 = vld [vmem:[#allocation5 + $0x7c4] ss:$8 sps:$4 sm:$0xff]  }
 0x102   :  { %2819 = vmatmul.mubr.bf16.vlgmr.msra.gmra.mrb[0].mxu1 %v407_v42  ;;  %v4518_v42 = vld [vmem:[#allocation5 + $0x2c0] ss:$8 sps:$4 sm:$0xff]  }
 0x103   :  { %3024 = vmatmul.mubr.bf16.vlgmr.msra.gmra.mrb[0].mxu0 %v417_v43  ;;  %2828 = vmatpush1.bf16.msra.mxu1 %v4442_v44  ;;  %v4521_v43 = vld [vmem:[#allocation5 + $0x7c0] ss:$8 sps:$4 sm:$0xff]   ;;  %v4526_v44 = vld [vmem:[#allocation5 + $0x2d4] ss:$8 sps:$4 sm:$0xff]  }
 0x104   :  { %3033 = vmatpush1.bf16.msra.mxu0 %v4449_v45  ;;  %2829 = vmatprep.subr.bf16.mxu1 %v4454_v47  ;;  %v4529_v45 = vld [vmem:[#allocation5 + $0x7d4] ss:$8 sps:$4 sm:$0xff]   ;;  %v4524_v47 = vld [vmem:[#allocation5 + $0x2d0] ss:$8 sps:$4 sm:$0xff]  }
 0x105   :  { %3034 = vmatprep.subr.bf16.mxu0 %v4457_v48  ;;  %2859 = vmatprep.mubr.bf16.mxu1 %v410_v5  ;;  %v4527_v48 = vld [vmem:[#allocation5 + $0x7d0] ss:$8 sps:$4 sm:$0xff]  }
 0x106   :  { %3064 = vmatprep.mubr.bf16.mxu0 %v420_v11  ;;  %v4539_v5 = vld [vmem:[#allocation5 + $0x7f0] ss:$8 sps:$4 sm:$0xff]  }
 0x107   :  { %2830 = vmatpush1.bf16.msra.mxu1 %v4452_v18  ;;  %v4532_v18 = vld [vmem:[#allocation5 + $0x2e4] ss:$8 sps:$4 sm:$0xff]  }
 0x108   :  { %3035 = vmatpush1.bf16.msra.mxu0 %v4455_v19  ;;  %2831 = vmatprep.subr.bf16.mxu1 %v4460_v49  ;;  %v4535_v19 = vld [vmem:[#allocation5 + $0x7e4] ss:$8 sps:$4 sm:$0xff]   ;;  %v4530_v49 = vld [vmem:[#allocation5 + $0x2e0] ss:$8 sps:$4 sm:$0xff]  }
 0x109   :  { %3036 = vmatprep.subr.bf16.mxu0 %v4463_v50  ;;  %v4533_v50 = vld [vmem:[#allocation5 + $0x7e0] ss:$8 sps:$4 sm:$0xff]  }
 0x10b   :  { %2832 = vmatpush1.bf16.msra.mxu1 %v4458_v51  ;;  %v4644_v51 = vld [vmem:[#allocation2 + $0xc] ss:$48 sps:$4 sm:$0xff]  }
 0x10c   :  { %3037 = vmatpush1.bf16.msra.mxu0 %v4461_v52  ;;  %2833 = vmatprep.subr.bf16.mxu1 %v4466_v54  ;;  %v4645_v52 = vld [vmem:[#allocation2 + $0x6c] ss:$48 sps:$4 sm:$0xff]   ;;  %v4649_v54 = vld [vmem:[#allocation2 + $0x20] ss:$48 sps:$4 sm:$0xff]   ;;  %v5280_v59 = vrot.slane %v4644_v51, %v5245_v53 }
 0x10d   :  { %3038 = vmatprep.subr.bf16.mxu0 %v4469_v55  ;;  %v4651_v55 = vld [vmem:[#allocation2 + $0x80] ss:$48 sps:$4 sm:$0xff]   ;;  %v5283_v61 = vrot.slane %v4645_v52, %v5245_v53 }
 0x10e   :  { %v4608_v51 = vld [vmem:[#allocation5 + $0x3a0] ss:$8 sps:$4 sm:$0xff]  }
 0x10f   :  { %2834 = vmatpush1.bf16.msra.mxu1 %v4464_v62  ;;  %v5286_v62 = vrot.slane %v4649_v54, %v5245_v53  ;;  %v4611_v52 = vld [vmem:[#allocation5 + $0x8a0] ss:$8 sps:$4 sm:$0xff]   ;;  %v4616_v54 = vld [vmem:[#allocation5 + $0x3b4] ss:$8 sps:$4 sm:$0xff]  }
 0x110   :  { %3039 = vmatpush1.bf16.msra.mxu0 %v4467_v63  ;;  %2835 = vmatprep.subr.bf16.mxu1 %v4472_v1  ;;  %v5289_v63 = vrot.slane %v4651_v55, %v5245_v53  ;;  %v233_v1 = vcombine.low %v5264_v58, %v5267_v60  ;;  %v4546_v58 = vld [vmem:[#allocation5 + $0x300] ss:$8 sps:$4 sm:$0xff]   ;;  %v4619_v55 = vld [vmem:[#allocation5 + $0x8b4] ss:$8 sps:$4 sm:$0xff]  }
 0x111   :  { %3040 = vmatprep.subr.bf16.mxu0 %v4475_v2  ;;  %v307_v2 = vcombine.low %v5270_v0, %v5275_v4  ;;  %v4551_v60 = vld [vmem:[#allocation5 + $0x800] ss:$8 sps:$4 sm:$0xff]   ;;  %v4556_v0 = vld [vmem:[#allocation5 + $0x314] ss:$8 sps:$4 sm:$0xff]  }
 0x112   :  { %v4559_v4 = vld [vmem:[#allocation5 + $0x814] ss:$8 sps:$4 sm:$0xff]  }
 0x113   :  { %2836 = vmatpush1.bf16.msra.mxu1 %v4470_v7  ;;  %v4553_v7 = vld [vmem:[#allocation5 + $0x804] ss:$8 sps:$4 sm:$0xff]   ;;  %v419_v11 = vpack.c.bf16 %v307_v2, %v307_v2 }
 0x114   :  { %3041 = vmatpush1.bf16.msra.mxu0 %v4473_v8  ;;  %2837 = vmatprep.subr.bf16.mxu1 %v4478_v9  ;;  %v236_v8 = vcombine.high %v5280_v59, %v5283_v61  ;;  %v342_v9 = vcombine.high %v5286_v62, %v5289_v63  ;;  %v4625_v2 = vld [vmem:[#allocation5 + $0x8c4] ss:$8 sps:$4 sm:$0xff]  }
 0x115   :  { %3042 = vmatprep.subr.bf16.mxu0 %v4481_v10  ;;  %v409_v10 = vpack.c.bf16 %v233_v1, %v233_v1  ;;  %v4622_v1 = vld [vmem:[#allocation5 + $0x3c4] ss:$8 sps:$4 sm:$0xff]  }
 0x117   :  { %2838 = vmatpush1.bf16.msra.mxu1 %v4476_v12  ;;  %v412_v12 = vpack.c.bf16 %v236_v8, %v236_v8  ;;  %v4626_v8 = vld [vmem:[#allocation5 + $0x3d0] ss:$8 sps:$4 sm:$0xff]  }
 0x118   :  { %3043 = vmatpush1.bf16.msra.mxu0 %v4479_v13  ;;  %2839 = vmatprep.subr.bf16.mxu1 %v4484_v14  ;;  %v422_v13 = vpack.c.bf16 %v342_v9, %v342_v9  ;;  %v4554_v14 = vld [vmem:[#allocation5 + $0x310] ss:$8 sps:$4 sm:$0xff]  }
 0x119   :  { %3044 = vmatprep.subr.bf16.mxu0 %v4487_v15  ;;  %v4557_v15 = vld [vmem:[#allocation5 + $0x810] ss:$8 sps:$4 sm:$0xff]  }
 0x11a   :  { %v4629_v9 = vld [vmem:[#allocation5 + $0x8d0] ss:$8 sps:$4 sm:$0xff]  }
 0x11b   :  { %2840 = vmatpush1.bf16.msra.mxu1 %v4482_v16  ;;  %v4562_v16 = vld [vmem:[#allocation5 + $0x324] ss:$8 sps:$4 sm:$0xff]  }
 0x11c   :  { %3045 = vmatpush1.bf16.msra.mxu0 %v4485_v17  ;;  %2841 = vmatprep.subr.bf16.mxu1 %v4490_v20  ;;  %v4565_v17 = vld [vmem:[#allocation5 + $0x824] ss:$8 sps:$4 sm:$0xff]   ;;  %v4560_v20 = vld [vmem:[#allocation5 + $0x320] ss:$8 sps:$4 sm:$0xff]  }
 0x11d   :  { %3046 = vmatprep.subr.bf16.mxu0 %v4493_v21  ;;  %v4563_v21 = vld [vmem:[#allocation5 + $0x820] ss:$8 sps:$4 sm:$0xff]  }
 0x11f   :  { %2842 = vmatpush1.bf16.msra.mxu1 %v4488_v22  ;;  %v4568_v22 = vld [vmem:[#allocation5 + $0x334] ss:$8 sps:$4 sm:$0xff]  }
 0x120   :  { %3047 = vmatpush1.bf16.msra.mxu0 %v4491_v23  ;;  %2843 = vmatprep.subr.bf16.mxu1 %v4496_v24  ;;  %v4571_v23 = vld [vmem:[#allocation5 + $0x834] ss:$8 sps:$4 sm:$0xff]   ;;  %v4566_v24 = vld [vmem:[#allocation5 + $0x330] ss:$8 sps:$4 sm:$0xff]  }
 0x121   :  { %3048 = vmatprep.subr.bf16.mxu0 %v4499_v25  ;;  %v4569_v25 = vld [vmem:[#allocation5 + $0x830] ss:$8 sps:$4 sm:$0xff]  }
 0x123   :  { %2844 = vmatpush1.bf16.msra.mxu1 %v4494_v26  ;;  %v4574_v26 = vld [vmem:[#allocation5 + $0x344] ss:$8 sps:$4 sm:$0xff]  }
 0x124   :  { %3049 = vmatpush1.bf16.msra.mxu0 %v4497_v27  ;;  %2845 = vmatprep.subr.bf16.mxu1 %v4502_v28  ;;  %v4577_v27 = vld [vmem:[#allocation5 + $0x844] ss:$8 sps:$4 sm:$0xff]   ;;  %v4572_v28 = vld [vmem:[#allocation5 + $0x340] ss:$8 sps:$4 sm:$0xff]  }
 0x125   :  { %3050 = vmatprep.subr.bf16.mxu0 %v4505_v29  ;;  %v4575_v29 = vld [vmem:[#allocation5 + $0x840] ss:$8 sps:$4 sm:$0xff]  }
 0x127   :  { %2846 = vmatpush1.bf16.msra.mxu1 %v4500_v30  ;;  %v4580_v30 = vld [vmem:[#allocation5 + $0x354] ss:$8 sps:$4 sm:$0xff]  }
 0x128   :  { %3051 = vmatpush1.bf16.msra.mxu0 %v4503_v31  ;;  %2847 = vmatprep.subr.bf16.mxu1 %v4508_v32  ;;  %v4583_v31 = vld [vmem:[#allocation5 + $0x854] ss:$8 sps:$4 sm:$0xff]   ;;  %v4578_v32 = vld [vmem:[#allocation5 + $0x350] ss:$8 sps:$4 sm:$0xff]  }
 0x129   :  { %3052 = vmatprep.subr.bf16.mxu0 %v4511_v33  ;;  %v4581_v33 = vld [vmem:[#allocation5 + $0x850] ss:$8 sps:$4 sm:$0xff]  }
 0x12b   :  { %2848 = vmatpush1.bf16.msra.mxu1 %v4506_v34  ;;  %v4586_v34 = vld [vmem:[#allocation5 + $0x364] ss:$8 sps:$4 sm:$0xff]  }
 0x12c   :  { %3053 = vmatpush1.bf16.msra.mxu0 %v4509_v35  ;;  %2849 = vmatprep.subr.bf16.mxu1 %v4514_v36  ;;  %v4589_v35 = vld [vmem:[#allocation5 + $0x864] ss:$8 sps:$4 sm:$0xff]   ;;  %v4584_v36 = vld [vmem:[#allocation5 + $0x360] ss:$8 sps:$4 sm:$0xff]  }
 0x12d   :  { %3054 = vmatprep.subr.bf16.mxu0 %v4517_v37  ;;  %v4587_v37 = vld [vmem:[#allocation5 + $0x860] ss:$8 sps:$4 sm:$0xff]  }
 0x12f   :  { %2850 = vmatpush1.bf16.msra.mxu1 %v4512_v38  ;;  %v4592_v38 = vld [vmem:[#allocation5 + $0x374] ss:$8 sps:$4 sm:$0xff]  }
 0x130   :  { %3055 = vmatpush1.bf16.msra.mxu0 %v4515_v39  ;;  %2851 = vmatprep.subr.bf16.mxu1 %v4520_v40  ;;  %v4595_v39 = vld [vmem:[#allocation5 + $0x874] ss:$8 sps:$4 sm:$0xff]   ;;  %v4590_v40 = vld [vmem:[#allocation5 + $0x370] ss:$8 sps:$4 sm:$0xff]  }
 0x131   :  { %3056 = vmatprep.subr.bf16.mxu0 %v4523_v41  ;;  %v4593_v41 = vld [vmem:[#allocation5 + $0x870] ss:$8 sps:$4 sm:$0xff]  }
 0x133   :  { %2852 = vmatpush1.bf16.msra.mxu1 %v4518_v42  ;;  %v4598_v42 = vld [vmem:[#allocation5 + $0x384] ss:$8 sps:$4 sm:$0xff]  }
 0x134   :  { %3057 = vmatpush1.bf16.msra.mxu0 %v4521_v43  ;;  %2853 = vmatprep.subr.bf16.mxu1 %v4526_v44  ;;  %v4601_v43 = vld [vmem:[#allocation5 + $0x884] ss:$8 sps:$4 sm:$0xff]   ;;  %v4596_v44 = vld [vmem:[#allocation5 + $0x380] ss:$8 sps:$4 sm:$0xff]  }
 0x135   :  { %3058 = vmatprep.subr.bf16.mxu0 %v4529_v45  ;;  %v4599_v45 = vld [vmem:[#allocation5 + $0x880] ss:$8 sps:$4 sm:$0xff]  }
 0x137   :  { %2854 = vmatpush1.bf16.msra.mxu1 %v4524_v47  ;;  %v4604_v47 = vld [vmem:[#allocation5 + $0x394] ss:$8 sps:$4 sm:$0xff]  }
 0x138   :  { %3059 = vmatpush1.bf16.msra.mxu0 %v4527_v48  ;;  %2855 = vmatprep.subr.bf16.mxu1 %v4532_v18  ;;  %v4607_v48 = vld [vmem:[#allocation5 + $0x894] ss:$8 sps:$4 sm:$0xff]   ;;  %v4602_v18 = vld [vmem:[#allocation5 + $0x390] ss:$8 sps:$4 sm:$0xff]  }
 0x139   :  { %3060 = vmatprep.subr.bf16.mxu0 %v4535_v19  ;;  %v4605_v19 = vld [vmem:[#allocation5 + $0x890] ss:$8 sps:$4 sm:$0xff]  }
 0x13b   :  { %2856 = vmatpush1.bf16.msra.mxu1 %v4530_v49  ;;  %v4610_v49 = vld [vmem:[#allocation5 + $0x3a4] ss:$8 sps:$4 sm:$0xff]  }
 0x13c   :  { %3061 = vmatpush1.bf16.msra.mxu0 %v4533_v50  ;;  %2857 = vmatprep.subr.bf16.mxu1 %v4538_v56  ;;  %v4613_v50 = vld [vmem:[#allocation5 + $0x8a4] ss:$8 sps:$4 sm:$0xff]   ;;  %v4614_v56 = vld [vmem:[#allocation5 + $0x3b0] ss:$8 sps:$4 sm:$0xff]  }
 0x13d   :  { %3062 = vmatprep.subr.bf16.mxu0 %v4541_v57  ;;  %v4617_v57 = vld [vmem:[#allocation5 + $0x8b0] ss:$8 sps:$4 sm:$0xff]  }
 0x13f   :  { %2858 = vmatpush1.bf16.msra.mxu1 %v4536_v3  ;;  %v4620_v3 = vld [vmem:[#allocation5 + $0x3c0] ss:$8 sps:$4 sm:$0xff]  }
 0x140   :  { %3063 = vmatpush1.bf16.msra.mxu0 %v4539_v5  ;;  %2868 = vmatprep.subr.bf16.mxu1 %v4548_v6  ;;  %v4623_v5 = vld [vmem:[#allocation5 + $0x8c0] ss:$8 sps:$4 sm:$0xff]   ;;  %v4628_v6 = vld [vmem:[#allocation5 + $0x3d4] ss:$8 sps:$4 sm:$0xff]  }
 0x141   :  { %3073 = vmatprep.subr.bf16.mxu0 %v4553_v7  ;;  %v4631_v7 = vld [vmem:[#allocation5 + $0x8d4] ss:$8 sps:$4 sm:$0xff]  }
 0x142   :  { %2860 = vmatmul.mubr.bf16.vlgmr.msra.gmra.mrb[0].mxu1 %v409_v10  ;;  %v4634_v10 = vld [vmem:[#allocation5 + $0x3e4] ss:$8 sps:$4 sm:$0xff]  }
 0x143   :  { %3065 = vmatmul.mubr.bf16.vlgmr.msra.gmra.mrb[0].mxu0 %v419_v11  ;;  %2869 = vmatpush1.bf16.msra.mxu1 %v4546_v58  ;;  %v4637_v11 = vld [vmem:[#allocation5 + $0x8e4] ss:$8 sps:$4 sm:$0xff]   ;;  %v4343_v58 = vld [vmem:[#allocation2 + $0x10] ss:$48 sps:$4 sm:$0xff]  }
 0x144   :  { %3074 = vmatpush1.bf16.msra.mxu0 %v4551_v60  ;;  %2870 = vmatprep.subr.bf16.mxu1 %v4556_v0  ;;  %v4346_v60 = vld [vmem:[#allocation2 + $0x70] ss:$48 sps:$4 sm:$0xff]   ;;  %v4746_v0 = vld [vmem:[#allocation2 + $0x24] ss:$48 sps:$4 sm:$0xff]  }
 0x145   :  { %3075 = vmatprep.subr.bf16.mxu0 %v4559_v4  ;;  %2900 = vmatprep.mubr.bf16.mxu1 %v412_v12  ;;  %v4747_v4 = vld [vmem:[#allocation2 + $0x84] ss:$48 sps:$4 sm:$0xff]   ;;  %v4632_v12 = vld [vmem:[#allocation5 + $0x3e0] ss:$8 sps:$4 sm:$0xff]  }
 0x146   :  { %3105 = vmatprep.mubr.bf16.mxu0 %v422_v13  ;;  %v4635_v13 = vld [vmem:[#allocation5 + $0x8e0] ss:$8 sps:$4 sm:$0xff]  }
 0x147   :  { %2871 = vmatpush1.bf16.msra.mxu1 %v4554_v14  ;;  %v4640_v14 = vld [vmem:[#allocation5 + $0x3f4] ss:$8 sps:$4 sm:$0xff]  }
 0x148   :  { %3076 = vmatpush1.bf16.msra.mxu0 %v4557_v15  ;;  %2872 = vmatprep.subr.bf16.mxu1 %v4562_v16  ;;  %v4643_v15 = vld [vmem:[#allocation5 + $0x8f4] ss:$8 sps:$4 sm:$0xff]   ;;  %v4638_v16 = vld [vmem:[#allocation5 + $0x3f0] ss:$8 sps:$4 sm:$0xff]  }
 0x149   :  { %3077 = vmatprep.subr.bf16.mxu0 %v4565_v17  ;;  %v4641_v17 = vld [vmem:[#allocation5 + $0x8f0] ss:$8 sps:$4 sm:$0xff]  }
 0x14b   :  { %2873 = vmatpush1.bf16.msra.mxu1 %v4560_v20  ;;  %v5300_v20 = vrot.slane %v4343_v58, %v5245_v53  ;;  %v4701_v58 = vld [vmem:[#allocation5 + $0x980] ss:$8 sps:$4 sm:$0xff]  }
 0x14c   :  { %3078 = vmatpush1.bf16.msra.mxu0 %v4563_v21  ;;  %2874 = vmatprep.subr.bf16.mxu1 %v4568_v22  ;;  %v5303_v21 = vrot.slane %v4346_v60, %v5245_v53  ;;  %v5306_v22 = vrot.slane %v4746_v0, %v5245_v53  ;;  %v4706_v60 = vld [vmem:[#allocation5 + $0x494] ss:$8 sps:$4 sm:$0xff]  }
 0x14d   :  { %3079 = vmatprep.subr.bf16.mxu0 %v4571_v23  ;;  %v5309_v23 = vrot.slane %v4747_v4, %v5245_v53  ;;  %v4709_v0 = vld [vmem:[#allocation5 + $0x994] ss:$8 sps:$4 sm:$0xff]   ;;  %v4704_v4 = vld [vmem:[#allocation5 + $0x490] ss:$8 sps:$4 sm:$0xff]  }
 0x14f   :  { %2875 = vmatpush1.bf16.msra.mxu1 %v4566_v24  ;;  %v235_v24 = vcombine.low %v5280_v59, %v5283_v61  ;;  %v270_v59 = vcombine.high %v5300_v20, %v5303_v21  ;;  %v344_v61 = vcombine.high %v5306_v22, %v5309_v23 }
 0x150   :  { %3080 = vmatpush1.bf16.msra.mxu0 %v4569_v25  ;;  %2876 = vmatprep.subr.bf16.mxu1 %v4574_v26  ;;  %v341_v25 = vcombine.low %v5286_v62, %v5289_v63  ;;  %v4796_v26 = vld [vmem:[#allocation2 + $0x28] ss:$48 sps:$4 sm:$0xff]  }
 0x151   :  { %3081 = vmatprep.subr.bf16.mxu0 %v4577_v27  ;;  %v4798_v27 = vld [vmem:[#allocation2 + $0x88] ss:$48 sps:$4 sm:$0xff]   ;;  %v411_v62 = vpack.c.bf16 %v235_v24, %v235_v24  ;;  %v4721_v24 = vld [vmem:[#allocation5 + $0x9b4] ss:$8 sps:$4 sm:$0xff]  }
 0x152   :  { %v421_v63 = vpack.c.bf16 %v341_v25, %v341_v25  ;;  %v4716_v25 = vld [vmem:[#allocation5 + $0x4b0] ss:$8 sps:$4 sm:$0xff]  }
 0x153   :  { %2877 = vmatpush1.bf16.msra.mxu1 %v4572_v28  ;;  %v4648_v28 = vld [vmem:[#allocation5 + $0x404] ss:$8 sps:$4 sm:$0xff]  }
 0x154   :  { %3082 = vmatpush1.bf16.msra.mxu0 %v4575_v29  ;;  %2878 = vmatprep.subr.bf16.mxu1 %v4580_v30  ;;  %v4655_v29 = vld [vmem:[#allocation5 + $0x904] ss:$8 sps:$4 sm:$0xff]   ;;  %v5316_v30 = vrot.slane %v4796_v26, %v5245_v53  ;;  %v4719_v26 = vld [vmem:[#allocation5 + $0x9b0] ss:$8 sps:$4 sm:$0xff]  }
 0x155   :  { %3083 = vmatprep.subr.bf16.mxu0 %v4583_v31  ;;  %v5319_v31 = vrot.slane %v4798_v27, %v5245_v53  ;;  %v4724_v27 = vld [vmem:[#allocation5 + $0x4c4] ss:$8 sps:$4 sm:$0xff]  }
 0x157   :  { %2879 = vmatpush1.bf16.msra.mxu1 %v4578_v32  ;;  %v4646_v32 = vld [vmem:[#allocation5 + $0x400] ss:$8 sps:$4 sm:$0xff]  }
 0x158   :  { %3084 = vmatpush1.bf16.msra.mxu0 %v4581_v33  ;;  %2880 = vmatprep.subr.bf16.mxu1 %v4586_v34  ;;  %v4653_v33 = vld [vmem:[#allocation5 + $0x900] ss:$8 sps:$4 sm:$0xff]   ;;  %v4658_v34 = vld [vmem:[#allocation5 + $0x414] ss:$8 sps:$4 sm:$0xff]  }
 0x159   :  { %3085 = vmatprep.subr.bf16.mxu0 %v4589_v35  ;;  %v4661_v35 = vld [vmem:[#allocation5 + $0x914] ss:$8 sps:$4 sm:$0xff]  }
 0x15b   :  { %2881 = vmatpush1.bf16.msra.mxu1 %v4584_v36  ;;  %v5327_v36 = vcombine.low %v5316_v30, %v5319_v31 }
 0x15c   :  { %3086 = vmatpush1.bf16.msra.mxu0 %v4587_v37  ;;  %2882 = vmatprep.subr.bf16.mxu1 %v4592_v38  ;;  %v4656_v37 = vld [vmem:[#allocation5 + $0x410] ss:$8 sps:$4 sm:$0xff]  }
 0x15d   :  { %3087 = vmatprep.subr.bf16.mxu0 %v4595_v39  ;;  %v4659_v38 = vld [vmem:[#allocation5 + $0x910] ss:$8 sps:$4 sm:$0xff]   ;;  %v414_v39 = vpack.c.bf16 %v270_v59, %v270_v59  ;;  %v4733_v59 = vld [vmem:[#allocation5 + $0x9d4] ss:$8 sps:$4 sm:$0xff]  }
 0x15f   :  { %2883 = vmatpush1.bf16.msra.mxu1 %v4590_v40  ;;  %v424_v40 = vpack.c.bf16 %v344_v61, %v344_v61  ;;  %v4728_v61 = vld [vmem:[#allocation5 + $0x4d0] ss:$8 sps:$4 sm:$0xff]  }
 0x160   :  { %3088 = vmatpush1.bf16.msra.mxu0 %v4593_v41  ;;  %2884 = vmatprep.subr.bf16.mxu1 %v4598_v42  ;;  %v4664_v41 = vld [vmem:[#allocation5 + $0x424] ss:$8 sps:$4 sm:$0xff]  }
 0x161   :  { %3089 = vmatprep.subr.bf16.mxu0 %v4601_v43  ;;  %v4667_v42 = vld [vmem:[#allocation5 + $0x924] ss:$8 sps:$4 sm:$0xff]   ;;  %v4662_v43 = vld [vmem:[#allocation5 + $0x420] ss:$8 sps:$4 sm:$0xff]  }
 0x163   :  { %2885 = vmatpush1.bf16.msra.mxu1 %v4596_v44  ;;  %v4665_v44 = vld [vmem:[#allocation5 + $0x920] ss:$8 sps:$4 sm:$0xff]  }
 0x164   :  { %3090 = vmatpush1.bf16.msra.mxu0 %v4599_v45  ;;  %2886 = vmatprep.subr.bf16.mxu1 %v4604_v47  ;;  %v4670_v45 = vld [vmem:[#allocation5 + $0x434] ss:$8 sps:$4 sm:$0xff]  }
 0x165   :  { %3091 = vmatprep.subr.bf16.mxu0 %v4607_v48  ;;  %v4673_v47 = vld [vmem:[#allocation5 + $0x934] ss:$8 sps:$4 sm:$0xff]   ;;  %v4668_v48 = vld [vmem:[#allocation5 + $0x430] ss:$8 sps:$4 sm:$0xff]  }
 0x167   :  { %2887 = vmatpush1.bf16.msra.mxu1 %v4602_v18  ;;  %v4671_v18 = vld [vmem:[#allocation5 + $0x930] ss:$8 sps:$4 sm:$0xff]  }
 0x168   :  { %3092 = vmatpush1.bf16.msra.mxu0 %v4605_v19  ;;  %2888 = vmatprep.subr.bf16.mxu1 %v4610_v49  ;;  %v4676_v19 = vld [vmem:[#allocation5 + $0x444] ss:$8 sps:$4 sm:$0xff]  }
 0x169   :  { %3093 = vmatprep.subr.bf16.mxu0 %v4613_v50  ;;  %v4679_v49 = vld [vmem:[#allocation5 + $0x944] ss:$8 sps:$4 sm:$0xff]   ;;  %v4674_v50 = vld [vmem:[#allocation5 + $0x440] ss:$8 sps:$4 sm:$0xff]  }
 0x16b   :  { %2889 = vmatpush1.bf16.msra.mxu1 %v4608_v51  ;;  %v4677_v51 = vld [vmem:[#allocation5 + $0x940] ss:$8 sps:$4 sm:$0xff]  }
 0x16c   :  { %3094 = vmatpush1.bf16.msra.mxu0 %v4611_v52  ;;  %2890 = vmatprep.subr.bf16.mxu1 %v4616_v54  ;;  %v4682_v52 = vld [vmem:[#allocation5 + $0x454] ss:$8 sps:$4 sm:$0xff]  }
 0x16d   :  { %3095 = vmatprep.subr.bf16.mxu0 %v4619_v55  ;;  %v4685_v54 = vld [vmem:[#allocation5 + $0x954] ss:$8 sps:$4 sm:$0xff]   ;;  %v4680_v55 = vld [vmem:[#allocation5 + $0x450] ss:$8 sps:$4 sm:$0xff]  }
 0x16f   :  { %2891 = vmatpush1.bf16.msra.mxu1 %v4614_v56  ;;  %v4683_v56 = vld [vmem:[#allocation5 + $0x950] ss:$8 sps:$4 sm:$0xff]  }
 0x170   :  { %3096 = vmatpush1.bf16.msra.mxu0 %v4617_v57  ;;  %2892 = vmatprep.subr.bf16.mxu1 %v4622_v1  ;;  %v4688_v57 = vld [vmem:[#allocation5 + $0x464] ss:$8 sps:$4 sm:$0xff]  }
 0x171   :  { %3097 = vmatprep.subr.bf16.mxu0 %v4625_v2  ;;  %v4691_v1 = vld [vmem:[#allocation5 + $0x964] ss:$8 sps:$4 sm:$0xff]   ;;  %v4686_v2 = vld [vmem:[#allocation5 + $0x460] ss:$8 sps:$4 sm:$0xff]  }
 0x173   :  { %2893 = vmatpush1.bf16.msra.mxu1 %v4620_v3  ;;  %v4689_v3 = vld [vmem:[#allocation5 + $0x960] ss:$8 sps:$4 sm:$0xff]  }
 0x174   :  { %3098 = vmatpush1.bf16.msra.mxu0 %v4623_v5  ;;  %2894 = vmatprep.subr.bf16.mxu1 %v4628_v6  ;;  %v4694_v5 = vld [vmem:[#allocation5 + $0x474] ss:$8 sps:$4 sm:$0xff]  }
 0x175   :  { %3099 = vmatprep.subr.bf16.mxu0 %v4631_v7  ;;  %v4697_v6 = vld [vmem:[#allocation5 + $0x974] ss:$8 sps:$4 sm:$0xff]   ;;  %v4692_v7 = vld [vmem:[#allocation5 + $0x470] ss:$8 sps:$4 sm:$0xff]  }
 0x177   :  { %2895 = vmatpush1.bf16.msra.mxu1 %v4626_v8  ;;  %v4695_v8 = vld [vmem:[#allocation5 + $0x970] ss:$8 sps:$4 sm:$0xff]  }
 0x178   :  { %3100 = vmatpush1.bf16.msra.mxu0 %v4629_v9  ;;  %2896 = vmatprep.subr.bf16.mxu1 %v4634_v10  ;;  %v4700_v9 = vld [vmem:[#allocation5 + $0x484] ss:$8 sps:$4 sm:$0xff]  }
 0x179   :  { %3101 = vmatprep.subr.bf16.mxu0 %v4637_v11  ;;  %v4703_v10 = vld [vmem:[#allocation5 + $0x984] ss:$8 sps:$4 sm:$0xff]   ;;  %v4698_v11 = vld [vmem:[#allocation5 + $0x480] ss:$8 sps:$4 sm:$0xff]  }
 0x17b   :  { %2897 = vmatpush1.bf16.msra.mxu1 %v4632_v12  ;;  %v4707_v12 = vld [vmem:[#allocation5 + $0x990] ss:$8 sps:$4 sm:$0xff]  }
 0x17c   :  { %3102 = vmatpush1.bf16.msra.mxu0 %v4635_v13  ;;  %2898 = vmatprep.subr.bf16.mxu1 %v4640_v14  ;;  %v4712_v13 = vld [vmem:[#allocation5 + $0x4a4] ss:$8 sps:$4 sm:$0xff]  }
 0x17d   :  { %3103 = vmatprep.subr.bf16.mxu0 %v4643_v15  ;;  %v4715_v14 = vld [vmem:[#allocation5 + $0x9a4] ss:$8 sps:$4 sm:$0xff]   ;;  %v4710_v15 = vld [vmem:[#allocation5 + $0x4a0] ss:$8 sps:$4 sm:$0xff]  }
 0x17f   :  { %2899 = vmatpush1.bf16.msra.mxu1 %v4638_v16  ;;  %v4713_v16 = vld [vmem:[#allocation5 + $0x9a0] ss:$8 sps:$4 sm:$0xff]  }
 0x180   :  { %3104 = vmatpush1.bf16.msra.mxu0 %v4641_v17  ;;  %2909 = vmatprep.subr.bf16.mxu1 %v4648_v28  ;;  %v4718_v17 = vld [vmem:[#allocation5 + $0x4b4] ss:$8 sps:$4 sm:$0xff]   ;;  %v4727_v28 = vld [vmem:[#allocation5 + $0x9c4] ss:$8 sps:$4 sm:$0xff]  }
 0x181   :  { %3114 = vmatprep.subr.bf16.mxu0 %v4655_v29  ;;  %v4722_v29 = vld [vmem:[#allocation5 + $0x4c0] ss:$8 sps:$4 sm:$0xff]  }
 0x182   :  { %2901 = vmatmul.mubr.bf16.vlgmr.msra.gmra.mrb[0].mxu1 %v411_v62  ;;  %v4731_v62 = vld [vmem:[#allocation5 + $0x9d0] ss:$8 sps:$4 sm:$0xff]  }
 0x183   :  { %3106 = vmatmul.mubr.bf16.vlgmr.msra.gmra.mrb[0].mxu0 %v421_v63  ;;  %2910 = vmatpush1.bf16.msra.mxu1 %v4646_v32  ;;  %v4725_v32 = vld [vmem:[#allocation5 + $0x9c0] ss:$8 sps:$4 sm:$0xff]   ;;  %v4736_v63 = vld [vmem:[#allocation5 + $0x4e4] ss:$8 sps:$4 sm:$0xff]  }
 0x184   :  { %3115 = vmatpush1.bf16.msra.mxu0 %v4653_v33  ;;  %2911 = vmatprep.subr.bf16.mxu1 %v4658_v34  ;;  %v4730_v33 = vld [vmem:[#allocation5 + $0x4d4] ss:$8 sps:$4 sm:$0xff]   ;;  %v4739_v34 = vld [vmem:[#allocation5 + $0x9e4] ss:$8 sps:$4 sm:$0xff]  }
 0x185   :  { %3116 = vmatprep.subr.bf16.mxu0 %v4661_v35  ;;  %2941 = vmatprep.mubr.bf16.mxu1 %v414_v39  ;;  %v4734_v35 = vld [vmem:[#allocation5 + $0x4e0] ss:$8 sps:$4 sm:$0xff]   ;;  %v4745_v39 = vld [vmem:[#allocation5 + $0x9f4] ss:$8 sps:$4 sm:$0xff]  }
 0x186   :  { %3146 = vmatprep.mubr.bf16.mxu0 %v424_v40  ;;  %v4848_v40 = vld [vmem:[#allocation2 + $0x2c] ss:$48 sps:$4 sm:$0xff]  }
 0x187   :  { %2912 = vmatpush1.bf16.msra.mxu1 %v4656_v37  ;;  %v4737_v37 = vld [vmem:[#allocation5 + $0x9e0] ss:$8 sps:$4 sm:$0xff]  }
 0x188   :  { %3117 = vmatpush1.bf16.msra.mxu0 %v4659_v38  ;;  %2913 = vmatprep.subr.bf16.mxu1 %v4664_v41  ;;  %v4742_v38 = vld [vmem:[#allocation5 + $0x4f4] ss:$8 sps:$4 sm:$0xff]  }
 0x189   :  { %3118 = vmatprep.subr.bf16.mxu0 %v4667_v42  ;;  %v4849_v41 = vld [vmem:[#allocation2 + $0x8c] ss:$48 sps:$4 sm:$0xff]   ;;  %v269_v42 = vcombine.low %v5300_v20, %v5303_v21 }
 0x18b   :  { %2914 = vmatpush1.bf16.msra.mxu1 %v4662_v43  ;;  %v343_v43 = vcombine.low %v5306_v22, %v5309_v23  ;;  %v413_v20 = vpack.c.bf16 %v269_v42, %v269_v42  ;;  %v4748_v23 = vld [vmem:[#allocation5 + $0xa00] ss:$8 sps:$4 sm:$0xff]  }
 0x18c   :  { %3119 = vmatpush1.bf16.msra.mxu0 %v4665_v44  ;;  %2915 = vmatprep.subr.bf16.mxu1 %v4670_v45  ;;  %v4740_v44 = vld [vmem:[#allocation5 + $0x4f0] ss:$8 sps:$4 sm:$0xff]  }
 0x18d   :  { %3120 = vmatprep.subr.bf16.mxu0 %v4673_v47  ;;  %v4743_v45 = vld [vmem:[#allocation5 + $0x9f0] ss:$8 sps:$4 sm:$0xff]   ;;  %v378_v47 = vcombine.high %v5316_v30, %v5319_v31  ;;  %v423_v21 = vpack.c.bf16 %v343_v43, %v343_v43  ;;  %v4753_v30 = vld [vmem:[#allocation5 + $0xa14] ss:$8 sps:$4 sm:$0xff]   ;;  %v4756_v31 = vld [vmem:[#allocation5 + $0xa24] ss:$8 sps:$4 sm:$0xff]  }
 0x18e   :  { %v4855_v42 = vld [vmem:[#allocation8 + $0x14] ss:$8 sps:$4 sm:$0xff]  }
 0x18f   :  { %2916 = vmatpush1.bf16.msra.mxu1 %v4668_v48  ;;  %v5336_v48 = vrot.slane %v4848_v40, %v5245_v53  ;;  %v4850_v40 = vld [vmem:[#allocation8] ss:$8 sps:$4 sm:$0xff]   ;;  %v4821_v43 = vld [vmem:[#allocation5 + $0xb70] ss:$8 sps:$4 sm:$0xff]  }
 0x190   :  { %3121 = vmatpush1.bf16.msra.mxu0 %v4671_v18  ;;  %2917 = vmatprep.subr.bf16.mxu1 %v4676_v19  ;;  %v5339_v18 = vrot.slane %v4849_v41, %v5245_v53  ;;  %v4750_v19 = vld [vmem:[#allocation5 + $0xa04] ss:$8 sps:$4 sm:$0xff]   ;;  %v4751_v53 = vld [vmem:[#allocation5 + $0xa10] ss:$8 sps:$4 sm:$0xff]  }
 0x191   :  { %3122 = vmatprep.subr.bf16.mxu0 %v4679_v49  ;;  %v426_v49 = vpack.c.bf16 %v378_v47, %v378_v47  ;;  %v4852_v41 = vld [vmem:[#allocation8 + $0x4] ss:$8 sps:$4 sm:$0xff]  }
 0x192   :  { %v5343_v22 = vcombine.low %v5336_v48, %v5339_v18  ;;  %v4858_v47 = vld [vmem:[#allocation8 + $0x24] ss:$8 sps:$4 sm:$0xff]  }
 0x193   :  { %2918 = vmatpush1.bf16.msra.mxu1 %v4674_v50  ;;  %v4754_v50 = vld [vmem:[#allocation5 + $0xa20] ss:$8 sps:$4 sm:$0xff]  }
 0x194   :  { %3123 = vmatpush1.bf16.msra.mxu0 %v4677_v51  ;;  %2919 = vmatprep.subr.bf16.mxu1 %v4682_v52  ;;  %v4759_v51 = vld [vmem:[#allocation5 + $0xa34] ss:$8 sps:$4 sm:$0xff]   ;;  %v4757_v52 = vld [vmem:[#allocation5 + $0xa30] ss:$8 sps:$4 sm:$0xff]  }
 0x195   :  { %3124 = vmatprep.subr.bf16.mxu0 %v4685_v54  ;;  %v4762_v54 = vld [vmem:[#allocation5 + $0xa44] ss:$8 sps:$4 sm:$0xff]  }
 0x197   :  { %2920 = vmatpush1.bf16.msra.mxu1 %v4680_v55  ;;  %v4760_v55 = vld [vmem:[#allocation5 + $0xa40] ss:$8 sps:$4 sm:$0xff]  }
 0x198   :  { %3125 = vmatpush1.bf16.msra.mxu0 %v4683_v56  ;;  %2921 = vmatprep.subr.bf16.mxu1 %v4688_v57  ;;  %v4765_v56 = vld [vmem:[#allocation5 + $0xa54] ss:$8 sps:$4 sm:$0xff]   ;;  %v4763_v57 = vld [vmem:[#allocation5 + $0xa50] ss:$8 sps:$4 sm:$0xff]  }
 0x199   :  { %3126 = vmatprep.subr.bf16.mxu0 %v4691_v1  ;;  %v4768_v1 = vld [vmem:[#allocation5 + $0xa64] ss:$8 sps:$4 sm:$0xff]  }
 0x19b   :  { %2922 = vmatpush1.bf16.msra.mxu1 %v4686_v2  ;;  %v4766_v2 = vld [vmem:[#allocation5 + $0xa60] ss:$8 sps:$4 sm:$0xff]  }
 0x19c   :  { %3127 = vmatpush1.bf16.msra.mxu0 %v4689_v3  ;;  %2923 = vmatprep.subr.bf16.mxu1 %v4694_v5  ;;  %v4771_v3 = vld [vmem:[#allocation5 + $0xa74] ss:$8 sps:$4 sm:$0xff]   ;;  %v4769_v5 = vld [vmem:[#allocation5 + $0xa70] ss:$8 sps:$4 sm:$0xff]  }
 0x19d   :  { %3128 = vmatprep.subr.bf16.mxu0 %v4697_v6  ;;  %v4774_v6 = vld [vmem:[#allocation5 + $0xa84] ss:$8 sps:$4 sm:$0xff]  }
 0x19f   :  { %2924 = vmatpush1.bf16.msra.mxu1 %v4692_v7  ;;  %v4772_v7 = vld [vmem:[#allocation5 + $0xa80] ss:$8 sps:$4 sm:$0xff]  }
 0x1a0   :  { %3129 = vmatpush1.bf16.msra.mxu0 %v4695_v8  ;;  %2925 = vmatprep.subr.bf16.mxu1 %v4700_v9  ;;  %v4777_v8 = vld [vmem:[#allocation5 + $0xa94] ss:$8 sps:$4 sm:$0xff]   ;;  %v4775_v9 = vld [vmem:[#allocation5 + $0xa90] ss:$8 sps:$4 sm:$0xff]  }
 0x1a1   :  { %3130 = vmatprep.subr.bf16.mxu0 %v4703_v10  ;;  %v4780_v10 = vld [vmem:[#allocation5 + $0xaa4] ss:$8 sps:$4 sm:$0xff]  }
 0x1a3   :  { %2926 = vmatpush1.bf16.msra.mxu1 %v4698_v11  ;;  %v4778_v11 = vld [vmem:[#allocation5 + $0xaa0] ss:$8 sps:$4 sm:$0xff]  }
 0x1a4   :  { %3131 = vmatpush1.bf16.msra.mxu0 %v4701_v58  ;;  %2927 = vmatprep.subr.bf16.mxu1 %v4706_v60  ;;  %v4783_v58 = vld [vmem:[#allocation5 + $0xab4] ss:$8 sps:$4 sm:$0xff]   ;;  %v4781_v60 = vld [vmem:[#allocation5 + $0xab0] ss:$8 sps:$4 sm:$0xff]  }
 0x1a5   :  { %3132 = vmatprep.subr.bf16.mxu0 %v4709_v0  ;;  %v4786_v0 = vld [vmem:[#allocation5 + $0xac4] ss:$8 sps:$4 sm:$0xff]  }
 0x1a7   :  { %2928 = vmatpush1.bf16.msra.mxu1 %v4704_v4  ;;  %v4784_v4 = vld [vmem:[#allocation5 + $0xac0] ss:$8 sps:$4 sm:$0xff]  }
 0x1a8   :  { %3133 = vmatpush1.bf16.msra.mxu0 %v4707_v12  ;;  %2929 = vmatprep.subr.bf16.mxu1 %v4712_v13  ;;  %v4789_v12 = vld [vmem:[#allocation5 + $0xad4] ss:$8 sps:$4 sm:$0xff]   ;;  %v4787_v13 = vld [vmem:[#allocation5 + $0xad0] ss:$8 sps:$4 sm:$0xff]  }
 0x1a9   :  { %3134 = vmatprep.subr.bf16.mxu0 %v4715_v14  ;;  %v4792_v14 = vld [vmem:[#allocation5 + $0xae4] ss:$8 sps:$4 sm:$0xff]  }
 0x1ab   :  { %2930 = vmatpush1.bf16.msra.mxu1 %v4710_v15  ;;  %v4790_v15 = vld [vmem:[#allocation5 + $0xae0] ss:$8 sps:$4 sm:$0xff]  }
 0x1ac   :  { %3135 = vmatpush1.bf16.msra.mxu0 %v4713_v16  ;;  %2931 = vmatprep.subr.bf16.mxu1 %v4718_v17  ;;  %v4795_v16 = vld [vmem:[#allocation5 + $0xaf4] ss:$8 sps:$4 sm:$0xff]   ;;  %v4793_v17 = vld [vmem:[#allocation5 + $0xaf0] ss:$8 sps:$4 sm:$0xff]  }
 0x1ad   :  { %3136 = vmatprep.subr.bf16.mxu0 %v4721_v24  ;;  %v380_v24 = vcombine.high %v5336_v48, %v5339_v18  ;;  %v4824_v48 = vld [vmem:[#allocation5 + $0xb80] ss:$8 sps:$4 sm:$0xff]  }
 0x1ae   :  { %v4856_v18 = vld [vmem:[#allocation8 + $0x20] ss:$8 sps:$4 sm:$0xff]  }
 0x1af   :  { %2932 = vmatpush1.bf16.msra.mxu1 %v4716_v25  ;;  %v4802_v25 = vld [vmem:[#allocation5 + $0xb04] ss:$8 sps:$4 sm:$0xff]  }
 0x1b0   :  { %3137 = vmatpush1.bf16.msra.mxu0 %v4719_v26  ;;  %2933 = vmatprep.subr.bf16.mxu1 %v4724_v27  ;;  %v425_v26 = vpack.c.bf16 %v5327_v36, %v5327_v36  ;;  %v4800_v27 = vld [vmem:[#allocation5 + $0xb00] ss:$8 sps:$4 sm:$0xff]  }
 0x1b1   :  { %3138 = vmatprep.subr.bf16.mxu0 %v4727_v28  ;;  %v428_v28 = vpack.c.bf16 %v380_v24, %v380_v24  ;;  %v4812_v36 = vld [vmem:[#allocation5 + $0xb40] ss:$8 sps:$4 sm:$0xff]  }
 0x1b2   :  { %v4891_v24 = vld [vmem:[#allocation8 + $0xd4] ss:$8 sps:$4 sm:$0xff]  }
 0x1b3   :  { %2934 = vmatpush1.bf16.msra.mxu1 %v4722_v29  ;;  %v4805_v29 = vld [vmem:[#allocation5 + $0xb14] ss:$8 sps:$4 sm:$0xff]  }
 0x1b4   :  { %3139 = vmatpush1.bf16.msra.mxu0 %v4725_v32  ;;  %2935 = vmatprep.subr.bf16.mxu1 %v4730_v33  ;;  %v4803_v32 = vld [vmem:[#allocation5 + $0xb10] ss:$8 sps:$4 sm:$0xff]   ;;  %v4808_v33 = vld [vmem:[#allocation5 + $0xb24] ss:$8 sps:$4 sm:$0xff]  }
 0x1b5   :  { %3140 = vmatprep.subr.bf16.mxu0 %v4733_v59  ;;  %v4806_v59 = vld [vmem:[#allocation5 + $0xb20] ss:$8 sps:$4 sm:$0xff]  }
 0x1b7   :  { %2936 = vmatpush1.bf16.msra.mxu1 %v4728_v61  ;;  %v4811_v61 = vld [vmem:[#allocation5 + $0xb34] ss:$8 sps:$4 sm:$0xff]  }
 0x1b8   :  { %3141 = vmatpush1.bf16.msra.mxu0 %v4731_v62  ;;  %2937 = vmatprep.subr.bf16.mxu1 %v4736_v63  ;;  %v4809_v62 = vld [vmem:[#allocation5 + $0xb30] ss:$8 sps:$4 sm:$0xff]   ;;  %v4814_v63 = vld [vmem:[#allocation5 + $0xb44] ss:$8 sps:$4 sm:$0xff]  }
 0x1b9   :  { %3142 = vmatprep.subr.bf16.mxu0 %v4739_v34  ;;  %v4817_v34 = vld [vmem:[#allocation5 + $0xb54] ss:$8 sps:$4 sm:$0xff]  }
 0x1bb   :  { %2938 = vmatpush1.bf16.msra.mxu1 %v4734_v35  ;;  %v4815_v35 = vld [vmem:[#allocation5 + $0xb50] ss:$8 sps:$4 sm:$0xff]  }
 0x1bc   :  { %3143 = vmatpush1.bf16.msra.mxu0 %v4737_v37  ;;  %2939 = vmatprep.subr.bf16.mxu1 %v4742_v38  ;;  %v4820_v37 = vld [vmem:[#allocation5 + $0xb64] ss:$8 sps:$4 sm:$0xff]   ;;  %v4818_v38 = vld [vmem:[#allocation5 + $0xb60] ss:$8 sps:$4 sm:$0xff]  }
 0x1bd   :  { %3144 = vmatprep.subr.bf16.mxu0 %v4745_v39  ;;  %v4823_v39 = vld [vmem:[#allocation5 + $0xb74] ss:$8 sps:$4 sm:$0xff]  }
 0x1bf   :  { %2940 = vmatpush1.bf16.msra.mxu1 %v4740_v44  ;;  %v4853_v44 = vld [vmem:[#allocation8 + $0x10] ss:$8 sps:$4 sm:$0xff]  }
 0x1c0   :  { %3145 = vmatpush1.bf16.msra.mxu0 %v4743_v45  ;;  %3445 = vmatprep.subr.bf16.mxu1 %v4852_v41  ;;  %v4826_v45 = vld [vmem:[#allocation5 + $0xb84] ss:$8 sps:$4 sm:$0xff]  }
 0x1c1   :  { %3155 = vmatprep.subr.bf16.mxu0 %v4750_v19  ;;  %v4829_v19 = vld [vmem:[#allocation5 + $0xb94] ss:$8 sps:$4 sm:$0xff]  }
 0x1c2   :  { %2942 = vmatmul.mubr.bf16.vlgmr.msra.gmra.mrb[0].mxu1 %v413_v20  ;;  %v4861_v20 = vld [vmem:[#allocation8 + $0x34] ss:$8 sps:$4 sm:$0xff]  }
 0x1c3   :  { %3147 = vmatmul.mubr.bf16.vlgmr.msra.gmra.mrb[0].mxu0 %v423_v21  ;;  %3446 = vmatpush1.bf16.msra.mxu1 %v4850_v40  ;;  %v4827_v21 = vld [vmem:[#allocation5 + $0xb90] ss:$8 sps:$4 sm:$0xff]  }
 0x1c4   :  { %3156 = vmatpush1.bf16.msra.mxu0 %v4748_v23  ;;  %3187 = vmatprep.mubr.bf16.mxu0 %v426_v49  ;;  %v4859_v23 = vld [vmem:[#allocation8 + $0x30] ss:$8 sps:$4 sm:$0xff]   ;;  %v4832_v49 = vld [vmem:[#allocation5 + $0xba4] ss:$8 sps:$4 sm:$0xff]  }
 0x1c5   :  { %3157 = vmatprep.subr.bf16.mxu0 %v4753_v30  ;;  %3447 = vmatprep.subr.bf16.mxu1 %v4855_v42  ;;  %v4864_v30 = vld [vmem:[#allocation8 + $0x44] ss:$8 sps:$4 sm:$0xff]  }
 0x1c7   :  { %3448 = vmatpush1.bf16.msra.mxu1 %v4853_v44 }
 0x1c8   :  { %3158 = vmatpush1.bf16.msra.mxu0 %v4751_v53  ;;  %3449 = vmatprep.subr.bf16.mxu1 %v4858_v47  ;;  %v4830_v53 = vld [vmem:[#allocation5 + $0xba0] ss:$8 sps:$4 sm:$0xff]  }
 0x1c9   :  { %3159 = vmatprep.subr.bf16.mxu0 %v4756_v31  ;;  %v4862_v31 = vld [vmem:[#allocation8 + $0x40] ss:$8 sps:$4 sm:$0xff]  }
 0x1cb   :  { %3450 = vmatpush1.bf16.msra.mxu1 %v4856_v18  ;;  %v4899_v18 = vld [vmem:[#allocation11] sm:$0xff]  }
 0x1cc   :  { %3160 = vmatpush1.bf16.msra.mxu0 %v4754_v50  ;;  %3451 = vmatprep.subr.bf16.mxu1 %v4861_v20  ;;  %v4835_v50 = vld [vmem:[#allocation5 + $0xbb4] ss:$8 sps:$4 sm:$0xff]   ;;  %v4900_v20 = vld [vmem:[#allocation11 + $0x48] sm:$0xff]  }
 0x1cd   :  { %3161 = vmatprep.subr.bf16.mxu0 %v4759_v51  ;;  %v4867_v51 = vld [vmem:[#allocation8 + $0x54] ss:$8 sps:$4 sm:$0xff]  }
 0x1cf   :  { %3452 = vmatpush1.bf16.msra.mxu1 %v4859_v23  ;;  %v4902_v23 = vld [vmem:[#allocation11 + $0x50] sm:$0xff]  }
 0x1d0   :  { %3162 = vmatpush1.bf16.msra.mxu0 %v4757_v52  ;;  %3453 = vmatprep.subr.bf16.mxu1 %v4864_v30  ;;  %v4833_v52 = vld [vmem:[#allocation5 + $0xbb0] ss:$8 sps:$4 sm:$0xff]   ;;  %v4904_v30 = vld [vmem:[#allocation11 + $0x58] sm:$0xff]  }
 0x1d1   :  { %3163 = vmatprep.subr.bf16.mxu0 %v4762_v54  ;;  %v4865_v54 = vld [vmem:[#allocation8 + $0x50] ss:$8 sps:$4 sm:$0xff]  }
 0x1d3   :  { %3454 = vmatpush1.bf16.msra.mxu1 %v4862_v31  ;;  %v4906_v31 = vld [vmem:[#allocation11 + $0x60] sm:$0xff]  }
 0x1d4   :  { %3164 = vmatpush1.bf16.msra.mxu0 %v4760_v55  ;;  %v4838_v55 = vld [vmem:[#allocation5 + $0xbc4] ss:$8 sps:$4 sm:$0xff]   ;;  %3455 = vmatprep.subr.bf16.mxu1 %v4867_v51 }
 0x1d5   :  { %3165 = vmatprep.subr.bf16.mxu0 %v4765_v56  ;;  %v4870_v56 = vld [vmem:[#allocation8 + $0x64] ss:$8 sps:$4 sm:$0xff]  }
 0x1d6   :  { %v4908_v51 = vld [vmem:[#allocation11 + $0x68] sm:$0xff]  }
 0x1d7   :  { %3456 = vmatpush1.bf16.msra.mxu1 %v4865_v54  ;;  %v4910_v54 = vld [vmem:[#allocation11 + $0x70] sm:$0xff]  }
 0x1d8   :  { %3166 = vmatpush1.bf16.msra.mxu0 %v4763_v57  ;;  %v4836_v57 = vld [vmem:[#allocation5 + $0xbc0] ss:$8 sps:$4 sm:$0xff]   ;;  %3457 = vmatprep.subr.bf16.mxu1 %v4870_v56 }
 0x1d9   :  { %3167 = vmatprep.subr.bf16.mxu0 %v4768_v1  ;;  %v4868_v1 = vld [vmem:[#allocation8 + $0x60] ss:$8 sps:$4 sm:$0xff]  }
 0x1da   :  { %v4912_v56 = vld [vmem:[#allocation11 + $0x78] sm:$0xff]  }
 0x1db   :  { %3458 = vmatpush1.bf16.msra.mxu1 %v4868_v1  ;;  %v3273_v1 = vld [vmem:[#allocation10] sm:$0x3] }
 0x1dc   :  { %3168 = vmatpush1.bf16.msra.mxu0 %v4766_v2  ;;  %v4841_v2 = vld [vmem:[#allocation5 + $0xbd4] ss:$8 sps:$4 sm:$0xff]  }
 0x1dd   :  { %3169 = vmatprep.subr.bf16.mxu0 %v4771_v3  ;;  %v4873_v3 = vld [vmem:[#allocation8 + $0x74] ss:$8 sps:$4 sm:$0xff]  }
 0x1de   :  { %3459 = vmatprep.subr.bf16.mxu1 %v4873_v3 }
 0x1e0   :  { %3170 = vmatpush1.bf16.msra.mxu0 %v4769_v5  ;;  %v4839_v5 = vld [vmem:[#allocation5 + $0xbd0] ss:$8 sps:$4 sm:$0xff]  }
 0x1e1   :  { %3171 = vmatprep.subr.bf16.mxu0 %v4774_v6  ;;  %v4871_v6 = vld [vmem:[#allocation8 + $0x70] ss:$8 sps:$4 sm:$0xff]  }
 0x1e2   :  { %3460 = vmatpush1.bf16.msra.mxu1 %v4871_v6 }
 0x1e4   :  { %3172 = vmatpush1.bf16.msra.mxu0 %v4772_v7  ;;  %v4844_v7 = vld [vmem:[#allocation5 + $0xbe4] ss:$8 sps:$4 sm:$0xff]  }
 0x1e5   :  { %3173 = vmatprep.subr.bf16.mxu0 %v4777_v8  ;;  %v4876_v8 = vld [vmem:[#allocation8 + $0x84] ss:$8 sps:$4 sm:$0xff]  }
 0x1e6   :  { %3461 = vmatprep.subr.bf16.mxu1 %v4876_v8 }
 0x1e8   :  { %3174 = vmatpush1.bf16.msra.mxu0 %v4775_v9  ;;  %v4842_v9 = vld [vmem:[#allocation5 + $0xbe0] ss:$8 sps:$4 sm:$0xff]  }
 0x1e9   :  { %3175 = vmatprep.subr.bf16.mxu0 %v4780_v10  ;;  %v4874_v10 = vld [vmem:[#allocation8 + $0x80] ss:$8 sps:$4 sm:$0xff]  }
 0x1ea   :  { %3462 = vmatpush1.bf16.msra.mxu1 %v4874_v10 }
 0x1ec   :  { %3176 = vmatpush1.bf16.msra.mxu0 %v4778_v11  ;;  %v4847_v11 = vld [vmem:[#allocation5 + $0xbf4] ss:$8 sps:$4 sm:$0xff]  }
 0x1ed   :  { %3177 = vmatprep.subr.bf16.mxu0 %v4783_v58  ;;  %v4879_v58 = vld [vmem:[#allocation8 + $0x94] ss:$8 sps:$4 sm:$0xff]  }
 0x1ee   :  { %3463 = vmatprep.subr.bf16.mxu1 %v4879_v58 }
 0x1f0   :  { %3178 = vmatpush1.bf16.msra.mxu0 %v4781_v60  ;;  %v4845_v60 = vld [vmem:[#allocation5 + $0xbf0] ss:$8 sps:$4 sm:$0xff]  }
 0x1f1   :  { %3179 = vmatprep.subr.bf16.mxu0 %v4786_v0  ;;  %v4877_v0 = vld [vmem:[#allocation8 + $0x90] ss:$8 sps:$4 sm:$0xff]  }
 0x1f2   :  { %3464 = vmatpush1.bf16.msra.mxu1 %v4877_v0 }
 0x1f4   :  { %3180 = vmatpush1.bf16.msra.mxu0 %v4784_v4  ;;  %v4882_v4 = vld [vmem:[#allocation8 + $0xa4] ss:$8 sps:$4 sm:$0xff]  }
 0x1f5   :  { %3181 = vmatprep.subr.bf16.mxu0 %v4789_v12  ;;  %v427_v12 = vpack.c.bf16 %v5343_v22, %v5343_v22  ;;  %3465 = vmatprep.subr.bf16.mxu1 %v4882_v4  ;;  %v5114_v4 = vmov 1966171168  }
 0x1f8   :  { %3182 = vmatpush1.bf16.msra.mxu0 %v4787_v13  ;;  %v4880_v13 = vld [vmem:[#allocation8 + $0xa0] ss:$8 sps:$4 sm:$0xff]  }
 0x1f9   :  { %3183 = vmatprep.subr.bf16.mxu0 %v4792_v14  ;;  %v4885_v14 = vld [vmem:[#allocation8 + $0xb4] ss:$8 sps:$4 sm:$0xff]   ;;  %3466 = vmatpush1.bf16.msra.mxu1 %v4880_v13 }
 0x1fa   :  { %3467 = vmatprep.subr.bf16.mxu1 %v4885_v14 }
 0x1fc   :  { %3184 = vmatpush1.bf16.msra.mxu0 %v4790_v15  ;;  %v4883_v15 = vld [vmem:[#allocation8 + $0xb0] ss:$8 sps:$4 sm:$0xff]  }
 0x1fd   :  { %3185 = vmatprep.subr.bf16.mxu0 %v4795_v16  ;;  %v4888_v16 = vld [vmem:[#allocation8 + $0xc4] ss:$8 sps:$4 sm:$0xff]   ;;  %3468 = vmatpush1.bf16.msra.mxu1 %v4883_v15  ;;  %v4135_v15 = vld [vmem:[#allocation13] ss:$0 sm:$0xff] }
 0x1fe   :  { %3469 = vmatprep.subr.bf16.mxu1 %v4888_v16 }
 0x200   :  { %3186 = vmatpush1.bf16.msra.mxu0 %v4793_v17  ;;  %v4886_v17 = vld [vmem:[#allocation8 + $0xc0] ss:$8 sps:$4 sm:$0xff]  }
 0x201   :  { %3196 = vmatprep.subr.bf16.mxu0 %v4802_v25  ;;  %3470 = vmatpush1.bf16.msra.mxu1 %v4886_v17  ;;  %v4889_v25 = vld [vmem:[#allocation8 + $0xd0] ss:$8 sps:$4 sm:$0xff]  }
 0x202   :  { %3471 = vmatprep.subr.bf16.mxu1 %v4891_v24 }
 0x203   :  { %3188 = vmatmul.mubr.bf16.vlgmr.msra.gmra.mrb[0].mxu0 %v425_v26  ;;  %v4894_v26 = vld [vmem:[#allocation8 + $0xe4] ss:$8 sps:$4 sm:$0xff]  }
 0x204   :  { %3197 = vmatpush1.bf16.msra.mxu0 %v4800_v27  ;;  %3228 = vmatprep.mubr.bf16.mxu0 %v428_v28  ;;  %v4892_v27 = vld [vmem:[#allocation8 + $0xe0] ss:$8 sps:$4 sm:$0xff]  }
 0x205   :  { %3198 = vmatprep.subr.bf16.mxu0 %v4805_v29  ;;  %3472 = vmatpush1.bf16.msra.mxu1 %v4889_v25 }
 0x206   :  { %3473 = vmatprep.subr.bf16.mxu1 %v4894_v26 }
 0x208   :  { %3199 = vmatpush1.bf16.msra.mxu0 %v4803_v32 }
 0x209   :  { %3200 = vmatprep.subr.bf16.mxu0 %v4808_v33  ;;  %3474 = vmatpush1.bf16.msra.mxu1 %v4892_v27  ;;  %v4897_v33 = vld [vmem:[#allocation8 + $0xf4] ss:$8 sps:$4 sm:$0xff]  }
 0x20a   :  { %3475 = vmatprep.subr.bf16.mxu1 %v4897_v33 }
 0x20c   :  { %3201 = vmatpush1.bf16.msra.mxu0 %v4806_v59  ;;  %v4895_v59 = vld [vmem:[#allocation8 + $0xf0] ss:$8 sps:$4 sm:$0xff]  }
 0x20d   :  { %3202 = vmatprep.subr.bf16.mxu0 %v4811_v61  ;;  %3476 = vmatpush1.bf16.msra.mxu1 %v4895_v59  ;;  %v4898_v61 = vld [vmem:[#allocation11 + $0x40] sm:$0xff]  }
 0x20e   :  { %4154 = vmatprep.subr.bf16.mxu1 %v4898_v61 }
 0x210   :  { %3203 = vmatpush1.bf16.msra.mxu0 %v4809_v62  ;;  %v817_v62 = vsub.s32 0, %v5242_v46 }
 0x211   :  { %3204 = vmatprep.subr.bf16.mxu0 %v4814_v63  ;;  %v813_v63 = vld [vmem:[#allocation7] sm:$0x3] }
 0x214   :  { %3205 = vmatpush1.bf16.msra.mxu0 %v4812_v36  ;;  %v821_v36 = vsub.s32 1, %v5242_v46 }
 0x215   :  { %3206 = vmatprep.subr.bf16.mxu0 %v4817_v34  ;;  %v818_v34 = vrot.slane %v813_v63, %v817_v62 }
 0x216   :  { %v3282_v3 = vrot.slane %v3273_v1, %v821_v36 }
 0x218   :  { %3207 = vmatpush1.bf16.msra.mxu0 %v4815_v35  ;;  %v822_v35 = vrot.slane %v813_v63, %v821_v36 }
 0x219   :  { %3208 = vmatprep.subr.bf16.mxu0 %v4820_v37 }
 0x21c   :  { %3209 = vmatpush1.bf16.msra.mxu0 %v4818_v38 }
 0x21d   :  { %3210 = vmatprep.subr.bf16.mxu0 %v4823_v39 }
 0x220   :  { %3211 = vmatpush1.bf16.msra.mxu0 %v4821_v43 }
 0x221   :  { %3212 = vmatprep.subr.bf16.mxu0 %v4826_v45 }
 0x224   :  { %3213 = vmatpush1.bf16.msra.mxu0 %v4824_v48 }
 0x225   :  { %3214 = vmatprep.subr.bf16.mxu0 %v4829_v19 }
 0x228   :  { %3215 = vmatpush1.bf16.msra.mxu0 %v4827_v21  ;;  %v4901_v21 = vld [vmem:[#allocation11 + $0x8] sm:$0xff]  }
 0x229   :  { %3216 = vmatprep.subr.bf16.mxu0 %v4832_v49  ;;  %v4903_v49 = vld [vmem:[#allocation11 + $0x10] sm:$0xff]  }
 0x22c   :  { %3217 = vmatpush1.bf16.msra.mxu0 %v4830_v53  ;;  %v4905_v53 = vld [vmem:[#allocation11 + $0x18] sm:$0xff]  }
 0x22d   :  { %3218 = vmatprep.subr.bf16.mxu0 %v4835_v50  ;;  %v4907_v50 = vld [vmem:[#allocation11 + $0x20] sm:$0xff]  }
 0x230   :  { %3219 = vmatpush1.bf16.msra.mxu0 %v4833_v52  ;;  %v4909_v52 = vld [vmem:[#allocation11 + $0x28] sm:$0xff]  }
 0x231   :  { %3220 = vmatprep.subr.bf16.mxu0 %v4838_v55  ;;  %v4911_v55 = vld [vmem:[#allocation11 + $0x30] sm:$0xff]  }
 0x234   :  { %3221 = vmatpush1.bf16.msra.mxu0 %v4836_v57  ;;  %v4913_v57 = vld [vmem:[#allocation11 + $0x38] sm:$0xff]  }
 0x235   :  { %3222 = vmatprep.subr.bf16.mxu0 %v4841_v2  ;;  %v3278_v2 = vrot.slane %v3273_v1, %v817_v62 }
 0x238   :  { %3223 = vmatpush1.bf16.msra.mxu0 %v4839_v5 }
 0x239   :  { %3224 = vmatprep.subr.bf16.mxu0 %v4844_v7 }
 0x23c   :  { %3225 = vmatpush1.bf16.msra.mxu0 %v4842_v9 }
 0x23d   :  { %3226 = vmatprep.subr.bf16.mxu0 %v4847_v11 }
 0x240   :  { %3227 = vmatpush1.bf16.msra.mxu0 %v4845_v60 }
 0x243   :  { %3229 = vmatmul.mubr.bf16.vlgmr.msra.gmra.mrb[0].mxu0 %v427_v12  ;;  %v3668_v12 = vunpack.c.l.s4 %v5114_v4 }
 0x245   :  { %v3669_v14 = vunpack.c.0.s8 %v3668_v12 }
 0x295   :  { %v2943_v22 = vpop.f32.mrb[0].mxu1 }
 0x296   :  { %v2945_v28 = vpop.f32.mrb[1].mxu1  ;;  %v4176_v37 = vadd.f32 %v2943_v22, %v818_v34  ;;  %v3672_v22 = vsub.s32 %v3669_v14, %v5242_v46 }
 0x297   :  { %v2947_v29 = vpop.f32.mrb[2].mxu1  ;;  %v4178_v38 = vadd.f32 %v2945_v28, %v822_v35 }
 0x298   :  { %v2948_v32 = vpop.f32.mrb[3].mxu1 }
 0x316   :  { %v3230_v39 = vpop.f32.mrb[0].mxu0 }
 0x317   :  { %v4177_v40 = vadd.f32 %v4176_v37, %v3230_v39  ;;  %v3232_v41 = vpop.f32.mrb[1].mxu0 }
 0x318   :  { %v4179_v42 = vadd.f32 %v4178_v38, %v3232_v41  ;;  %v3234_v43 = vpop.f32.mrb[2].mxu0 }
 0x319   :  { %v3237_v44 = vmax.f32 %v4177_v40, 0.0  ;;  %v3235_v45 = vpop.f32.mrb[3].mxu0 }
 0x31a   :  { %v3238_v47 = vmax.f32 %v4179_v42, 0.0 }
 0x31b   :  { %v3239_v19 = vpack.c.bf16 %v3237_v44, %v3237_v44 }
 0x31c   :  { %v3240_v48 = vpack.c.bf16 %v3238_v47, %v3238_v47 }
 0x31e   :  { %3477 = vmatprep.mubr.bf16.mxu1 %v3240_v48 }
 0x31f   :  { %3478 = vmatmul.mubr.bf16.vlgmr.msra.gmra.mrb[4].mxu1 %v3239_v19 }
 0x320   :  { %4155 = vmatpush3.bf16.msra.mxu1 %v4899_v18 }
 0x321   :  { %4156 = vmatprep.subr.bf16.mxu1 %v4900_v20 }
 0x324   :  { %4157 = vmatpush3.bf16.msra.mxu1 %v4901_v21 }
 0x325   :  { %4158 = vmatprep.subr.bf16.mxu1 %v4902_v23 }
 0x328   :  { %4159 = vmatpush3.bf16.msra.mxu1 %v4903_v49 }
 0x329   :  { %4160 = vmatprep.subr.bf16.mxu1 %v4904_v30 }
 0x32c   :  { %4161 = vmatpush3.bf16.msra.mxu1 %v4905_v53 }
 0x32d   :  { %4162 = vmatprep.subr.bf16.mxu1 %v4906_v31 }
 0x330   :  { %4163 = vmatpush3.bf16.msra.mxu1 %v4907_v50 }
 0x331   :  { %4164 = vmatprep.subr.bf16.mxu1 %v4908_v51 }
 0x334   :  { %4165 = vmatpush3.bf16.msra.mxu1 %v4909_v52 }
 0x335   :  { %4166 = vmatprep.subr.bf16.mxu1 %v4910_v54 }
 0x338   :  { %4167 = vmatpush3.bf16.msra.mxu1 %v4911_v55 }
 0x339   :  { %4168 = vmatprep.subr.bf16.mxu1 %v4912_v56 }
 0x33c   :  { %4169 = vmatpush3.bf16.msra.mxu1 %v4913_v57 }
 0x3f2   :  { %v3479_v5 = vpop.f32.mrb[4].mxu1 }
 0x3f3   :  { %v3480_v6 = vadd.f32 %v3479_v5, %v3278_v2  ;;  %v3481_v7 = vpop.f32.mrb[5].mxu1 }
 0x3f4   :  { %v3482_v8 = vadd.f32 %v3481_v7, %v3282_v3  ;;  %v3483_v9 = vpop.f32.mrb[6].mxu1 }
 0x3f5   :  { %v3486_v10 = vmax.f32 %v3480_v6, 0.0  ;;  %v3484_v11 = vpop.f32.mrb[7].mxu1 }
 0x3f6   :  { %v3487_v58 = vmax.f32 %v3482_v8, 0.0 }
 0x3f7   :  { %v3488_v0 = vpack.c.bf16 %v3486_v10, %v3486_v10 }
 0x3f8   :  { %v3489_v60 = vpack.c.bf16 %v3487_v58, %v3487_v58 }
 0x3fa   :  { %3657 = vmatprep.mubr.bf16.mxu1 %v3489_v60 }
 0x3fb   :  { %3658 = vmatmul.mubr.bf16.vlgmr.msra.gmra.mrb[8].mxu1 %v3488_v0 }
 0x4ce   :  { %v4170_v13 = vpop.f32.mrb[8].mxu1 }
 0x4cf   :  { %v4171_v16 = vpop.f32.mrb[9].mxu1 }
 0x4d0   :  { %v4172_v17 = vadd.f32 %v4171_v16, %v4170_v13  ;;  %v4173_v24 = vpop.f32.mrb[10].mxu1 }
 0x4d1   :  { %v4174_v25 = vpop.f32.mrb[11].mxu1 }
 0x4d2   :  { %v3660_v26 = vadd.f32 %v4172_v17, %v4135_v15 }
 0x4d4   :  { %v3665_v27 = vpack.c.bf16 %v3660_v26, %v3660_v26 }
 0x4d6   :  { %v3673_v28 = vrot.slane %v3665_v27, %v3672_v22 }
 0x4d8   :  { %v3674_v29 = vcombine.high %v3673_v28, %v3673_v28  ;;  %v3681_v32 = vrot.slane %v3673_v28, %v3672_v22  ;;  %4152 = vst.sshfl [vmem:[#allocation14] sm:$0x1 pattern:$0x73625140] %v3673_v28 }
 0x4da   :  { %v3688_v33 = vrot.slane %v3674_v29, %v3672_v22  ;;  %v3689_v59 = vcombine.high %v3681_v32, %v3681_v32  ;;  %4153 = vst.sshfl [vmem:[#allocation14 + $0x1] sm:$0x1 pattern:$0x73625140] %v3674_v29 }
 0x4dc   :  { %v3690_v61 = vcombine.high %v3688_v33, %v3688_v33  ;;  %3697 = vst [vmem:[#allocation14 + $0x2] sm:$0x1] %v3689_v59 }
 0x4de   :  { %3698 = vst [vmem:[#allocation14 + $0x3] sm:$0x1] %v3690_v61 }
 0x4df   :  { %3703 = vsyncadd [#allocation4], 48  ;;  %s5115_s6 = smov [#allocation14]  }
 0x4e0   :  { %s3704_s11 = sshll.u32 %s5115_s6, 4  ;;  %s3705_s11 = int_to_ptr.vmem [resolvable:$true] %s3704_s11 }
 0x4e1   :  { %s5068_s12 = scalar_lea.vmem %s3705_s11, 16  ;;  %s5072_s15 = scalar_lea.vmem %s3705_s11, 64 }
 0x4e2   :  { %p5069_p0 = scmp.ne.s32.totalorder %s3705_s11, %s5068_s12  ;;  %p5073_p1 = scmp.lt.s32.totalorder %s3705_s11, %s3705_s11 }
 0x4e3   :  { %p5074_p2 = scmp.lt.s32.totalorder %s5072_s15, %s5068_s12 }
 0x4e5   :  { %p5075_p3 = por %p5074_p2, %p5073_p1 }
 0x4e7   :  { %p5076_p4 = pnand %p5075_p3, %p5069_p0 }
 0x4e9   :  { %5079 = shalt.err (!%p5076_p4)
}
 0x4ea   :  { %s5080_s17 = scalar_lea.hbm %s5373_s7, 16 }
 0x4eb   :  { %p5081_p5 = scmp.ne.s32.totalorder %s5373_s7, %s5080_s17  ;;  %p5084_p6 = scmp.lt.u32.totalorder %s5080_s17, %s5373_s7 }
 0x4ed   :  { %p5086_p7 = pnand %p5084_p6, %p5081_p5 }
 0x4ef   :  { %5089 = shalt.err (!%p5086_p7)
}
 0x4f0   :  { %s5116_s23 = smov 16   ;;  %s5117_s24 = smov 1  }
 0x4f1   :  { %3710 = dma.vmem_to_hbm [thread:$0]  %s3705_s11, 16, %s5373_s7, [#allocation4], %s5116_s23, %s5116_s23, %s5117_s24  }
 0x4f2   :  { %5098 = dma.done.wait [#allocation4], 64  }
 0x4f3   :  { %5099 = vsyncadd [#allocation4], 4294967232 }
 0x4f4   :  { %3714 = vsyncpa [#allocation3], 1 }
 0x4f5   :  { %3715 = vsyncpa [#allocation6], 1 }
 0x4f6   :  { %3716 = vsyncpa [#allocation9], 1 }
 0x4f7   :  { %3717 = vsyncpa [#allocation12], 1 }
 0x4f8   :  { %3718 = vsyncpa [#allocation4], 1 }

</bundles_post_ra>
